<compile_context>
chip_gen: v7x
topology: tpu7x:2x2x1
jax: 0.10.0
libtpu: 0.0.40
codegen_flags: <defaults>
</compile_context>

<pallas_src>
import jax
import jax.numpy as jnp
from jax.experimental import pallas as pl
from jax.experimental.pallas import tpu as pltpu


# ------------------------------ fused kernel ------------------------------- #

def make_cnn_kernel(H, W, C, K, num_layers, pad):
    HW = H * W

    def kernel(x_ref, wk_ref, bk_ref, w1_ref, dm_ref, rs_ref, bfc_ref,
               o_ref, buf_ref):
        # x_ref  : (1, C, HW)      f32  input (channels zero-padded to C)
        # wk_ref : (L, 9, C, C)    bf16 conv weights, wk[l, dy*3+dx, o, c]
        # bk_ref : (L, C, 1)       f32  conv biases
        # w1_ref : (HW, C*K)       bf16 fused pool-gather + FC weight
        # dm_ref : (C, C*K)        f32  block-diagonal mask (col // K == row)
        # rs_ref : (C*K, K)        f32  column gather      (row %  K == col)
        # bfc_ref: (1, K)          f32  FC bias
        # o_ref  : (1, 1, K)       f32  logits
        # buf_ref: (C, pad+HW+pad) f32  zero-padded line buffer (VMEM scratch)

        buf_ref[...] = jnp.zeros_like(buf_ref)        # borders = zero padding

        # output-pixel x coordinate; masks taps that would wrap across rows
        col = jax.lax.broadcasted_iota(jnp.int32, (1, HW), 1)
        xpos = col % W
        keep_l = xpos != 0            # valid outputs for taps with ox == -1
        keep_r = xpos != (W - 1)      # valid outputs for taps with ox == +1

        act = x_ref[0]                # (C, HW) f32

        for l in range(num_layers):                   # static unroll (3 layers)
            buf_ref[:, pl.ds(pad, HW)] = act          # stage in padded buffer
            acc = jnp.zeros((C, HW), jnp.float32)
            for i in range(3):                        # static unroll, 9 taps
                for j in range(3):
                    oy, ox = i - 1, j - 1
                    d = oy * W + ox
                    patch = buf_ref[:, pl.ds(pad + d, HW)]    # (C, HW) f32
                    if ox == -1:
                        patch = jnp.where(keep_l, patch, 0.0)
                    elif ox == 1:
                        patch = jnp.where(keep_r, patch, 0.0)
                    acc = acc + jnp.dot(
                        wk_ref[l, i * 3 + j],                  # (C, C) bf16
                        patch.astype(jnp.bfloat16),
                        preferred_element_type=jnp.float32)
            act = jnp.maximum(acc + bk_ref[l], 0.0)            # bias + ReLU
            # TODO(synk): nn.Dropout(p=0.5) treated as identity (eval mode).

        # ---- 2x2/stride-2 max pool, vectorized in the flat pixel domain ----
        buf_ref[:, pl.ds(pad, HW)] = act
        m1 = jnp.maximum(act, buf_ref[:, pl.ds(pad + 1, HW)])   # pair along x
        buf_ref[:, pl.ds(pad, HW)] = m1
        m2 = jnp.maximum(m1, buf_ref[:, pl.ds(pad + W, HW)])    # pair along y
        # m2[c, 2y'*W + 2x'] now holds the pooled value at (y', x').

        # ---- pooled-pixel gather + fully-connected layer (fused, on MXU) ----
        a_mat = jnp.dot(m2.astype(jnp.bfloat16), w1_ref[...],
                        preferred_element_type=jnp.float32)     # (C, C*K)
        b_mat = jnp.dot(a_mat * dm_ref[...], rs_ref[...],
                        preferred_element_type=jnp.float32)     # (C, K)
        logits = jnp.sum(b_mat, axis=0, keepdims=True) + bfc_ref[...]
        o_ref[0] = logits.astype(o_ref.dtype)

    return kernel


def cnn_forward_fused(x_nchw, wk, bk, w1big, dmask, rsel, bfc_row):
    N, Cin, H, W = x_nchw.shape
    L, _, C, _ = wk.shape
    K = bfc_row.shape[-1]
    HW = H * W
    PAD = 128                                   # lane-tile aligned interior
    assert W + 1 <= PAD

    x_flat = x_nchw.reshape(N, Cin, HW).astype(jnp.float32)
    if Cin < C:                                 # pad input channels to C
        x_flat = jnp.pad(x_flat, ((0, 0), (0, C - Cin), (0, 0)))

    out = pl.pallas_call(
        make_cnn_kernel(H, W, C, K, L, PAD),
        out_shape=jax.ShapeDtypeStruct((N, 1, K), jnp.float32),
        grid=(N,),
        in_specs=[
            pl.BlockSpec((1, C, HW), lambda n: (n, 0, 0)),
            pl.BlockSpec((L, 9, C, C), lambda n: (0, 0, 0, 0)),
            pl.BlockSpec((L, C, 1), lambda n: (0, 0, 0)),
            pl.BlockSpec((HW, C * K), lambda n: (0, 0)),
            pl.BlockSpec((C, C * K), lambda n: (0, 0)),
            pl.BlockSpec((C * K, K), lambda n: (0, 0)),
            pl.BlockSpec((1, K), lambda n: (0, 0)),
        ],
        out_specs=pl.BlockSpec((1, 1, K), lambda n: (n, 0, 0)),
        scratch_shapes=[pltpu.VMEM((C, PAD + HW + PAD), jnp.float32)],
        compiler_params=pltpu.CompilerParams(
            dimension_semantics=("parallel",)),      # both TensorCores on v7x
    )(x_flat, wk, bk, w1big, dmask, rsel, bfc_row)
    return out[:, 0, :]


cnn_forward = jax.jit(cnn_forward_fused)


# ----------------------------- parameter prep ------------------------------ #

def prep_conv_params(conv_ws, conv_bs, C):
    """torch-layout (O, I, 3, 3) conv weights -> (L, 9, C, C) bf16 tap matrices."""
    wt, bt = [], []
    for w, b in zip(conv_ws, conv_bs):
        o, ci = w.shape[0], w.shape[1]
        w_t = jnp.transpose(w, (2, 3, 0, 1)).reshape(9, o, ci)   # [dy*3+dx, o, c]
        if ci < C:
            w_t = jnp.pad(w_t, ((0, 0), (0, 0), (0, C - ci)))
        wt.append(w_t)
        bt.append(b.reshape(C, 1))
    return (jnp.stack(wt).astype(jnp.bfloat16),
            jnp.stack(bt).astype(jnp.float32))


def prep_fc_params(w_fc_torch, b_fc, C, H, W, K):
    """PyTorch fc weight (K, C*(H//2)*(W//2)) -> fused pool-gather + FC constants."""
    Hp, Wp = H // 2, W // 2
    P = Hp * Wp
    HW = H * W
    wfc4 = w_fc_torch.reshape(K, C, Hp, Wp)                      # [k, c, y', x']
    vals = jnp.transpose(wfc4, (2, 3, 1, 0)).reshape(P, C * K)   # row p, col c*K+k
    p_idx = jnp.arange(P)
    r_idx = 2 * W * (p_idx // Wp) + 2 * (p_idx % Wp)             # anchor pixels
    w1big = jnp.zeros((HW, C * K), jnp.float32).at[r_idx].set(vals)
    dmask = (jnp.arange(C * K)[None, :] // K
             == jnp.arange(C)[:, None]).astype(jnp.float32)
    rsel = (jnp.arange(C * K)[:, None] % K
            == jnp.arange(K)[None, :]).astype(jnp.float32)
    return (w1big.astype(jnp.bfloat16), dmask, rsel,
            b_fc.reshape(1, K).astype(jnp.float32))


# --------------------------- reference (plain JAX) -------------------------- #

def reference_forward(x_nchw, conv_ws, conv_bs, w_fc_torch, b_fc):
    x = x_nchw
    for w, b in zip(conv_ws, conv_bs):
        x = jax.lax.conv_general_dilated(
            x, w, window_strides=(1, 1), padding="SAME",
            dimension_numbers=("NCHW", "OIHW", "NCHW"))
        x = jnp.maximum(x + b.reshape(1, -1, 1, 1), 0.0)
    x = jax.lax.reduce_window(x, -jnp.inf, jax.lax.max,
                              (1, 1, 2, 2), (1, 1, 2, 2), "VALID")
    feats = x.reshape(x.shape[0], -1)            # PyTorch NCHW flatten
    return feats @ w_fc_torch.T + b_fc


# --------------------------------- main ------------------------------------ #

def glorot_uniform_conv(key, cout, cin, k=3):
    fan_in, fan_out = cin * k * k, cout * k * k          # xavier_uniform_
    limit = (6.0 / (fan_in + fan_out)) ** 0.5
    return jax.random.uniform(key, (cout, cin, k, k), jnp.float32, -limit, limit)


if __name__ == "__main__":
    N = 2
    C_in, H, W = 3, 16, 16                      # small input_shape=(3, 16, 16)
    num_filters, num_layers, num_classes = 16, 3, 10

    key = jax.random.PRNGKey(0)
    k_x, k_fcw, k_fcb, *k_convs = jax.random.split(key, 3 + num_layers)

    conv_ws, conv_bs = [], []
    cin = C_in
    for i in range(num_layers):
        conv_ws.append(glorot_uniform_conv(k_convs[i], num_filters, cin))
        conv_bs.append(jnp.zeros((num_filters,), jnp.float32))   # zeros_ bias
        cin = num_filters

    F = num_filters * (H // 2) * (W // 2)
    lim = 1.0 / (F ** 0.5)                       # PyTorch default Linear init
    w_fc = jax.random.uniform(k_fcw, (num_classes, F), jnp.float32, -lim, lim)
    b_fc = jax.random.uniform(k_fcb, (num_classes,), jnp.float32, -lim, lim)

    wk, bk = prep_conv_params(conv_ws, conv_bs, num_filters)
    w1big, dmask, rsel, bfc_row = prep_fc_params(
        w_fc, b_fc, num_filters, H, W, num_classes)

    x_nchw = jax.random.normal(k_x, (N, C_in, H, W), jnp.float32)

    logits = cnn_forward(x_nchw, wk, bk, w1big, dmask, rsel, bfc_row)
    logits = jax.block_until_ready(logits)

    ref = reference_forward(x_nchw, conv_ws, conv_bs, w_fc, b_fc)
    assert logits.shape == (N, num_classes), logits.shape
    assert bool(jnp.all(jnp.isfinite(logits)))
    assert bool(jnp.allclose(logits, ref, rtol=5e-2, atol=5e-2)), (
        f"max abs diff vs reference: {float(jnp.max(jnp.abs(logits - ref)))}")
    print("KERNEL_OK")
</pallas_src>

<mosaic_0001>
module attributes {stable_mosaic.version = 11 : i64} {
  func.func @kernel(%arg0: i32, %arg1: memref<1x16x256xf32, #tpu.memory_space<vmem>>, %arg2: memref<3x9x16x16xbf16, #tpu.memory_space<vmem>>, %arg3: memref<3x16x1xf32, #tpu.memory_space<vmem>>, %arg4: memref<256x160xbf16, #tpu.memory_space<vmem>>, %arg5: memref<16x160xf32, #tpu.memory_space<vmem>>, %arg6: memref<160x10xf32, #tpu.memory_space<vmem>>, %arg7: memref<1x10xf32, #tpu.memory_space<vmem>>, %arg8: memref<1x1x10xf32, #tpu.memory_space<vmem>>, %arg9: memref<16x512xf32, #tpu.memory_space<vmem>>) attributes {dimension_semantics = [#tpu.dimension_semantics<parallel>], iteration_bounds = array<i64: 2>, scalar_prefetch = 0 : i64, scratch_operands = 1 : i64, tpu.core_type = #tpu.core_type<tc>, window_params = [{transform_indices = @transform_0, window_bounds = array<i64: 1, 16, 256>}, {pipeline_mode = #tpu.pipeline_mode<synchronous>, transform_indices = @transform_1, window_bounds = array<i64: 3, 9, 16, 16>}, {pipeline_mode = #tpu.pipeline_mode<synchronous>, transform_indices = @transform_2, window_bounds = array<i64: 3, 16, 1>}, {pipeline_mode = #tpu.pipeline_mode<synchronous>, transform_indices = @transform_3, window_bounds = array<i64: 256, 160>}, {pipeline_mode = #tpu.pipeline_mode<synchronous>, transform_indices = @transform_4, window_bounds = array<i64: 16, 160>}, {pipeline_mode = #tpu.pipeline_mode<synchronous>, transform_indices = @transform_5, window_bounds = array<i64: 160, 10>}, {pipeline_mode = #tpu.pipeline_mode<synchronous>, transform_indices = @transform_6, window_bounds = array<i64: 1, 10>}, {transform_indices = @transform_7, window_bounds = array<i64: 1, 1, 10>}]} {
    %cst = arith.constant 0.000000e+00 : f32
    %0 = vector.broadcast %cst : f32 to vector<16x512xf32>
    %c0 = arith.constant 0 : index
    %c0_0 = arith.constant 0 : index
    %1 = vector.load %arg9[%c0, %c0_0] : memref<16x512xf32, #tpu.memory_space<vmem>>, vector<16x512xf32>
    tpu.vector_store %arg9[%c0, %c0_0], %0 {strides = array<i32>} : memref<16x512xf32, #tpu.memory_space<vmem>>, vector<16x512xf32>,
    %2 = tpu.iota {dimensions = array<i32: 1>} : vector<1x256xi32>
    %c16_i32 = arith.constant 16 : i32
    %c0_i32 = arith.constant 0 : i32
    %3 = arith.cmpi eq, %c16_i32, %c0_i32 : i32
    %c1_i32 = arith.constant 1 : i32
    %4 = arith.select %3, %c1_i32, %c16_i32 : i32
    %5 = vector.broadcast %4 : i32 to vector<1x256xi32>
    %6 = arith.remsi %2, %5 : vector<1x256xi32>
    %c0_i32_1 = arith.constant 0 : i32
    %7 = vector.broadcast %c0_i32_1 : i32 to vector<1x256xi32>
    %8 = arith.cmpi ne, %6, %7 : vector<1x256xi32>
    %c0_i32_2 = arith.constant 0 : i32
    %9 = vector.broadcast %c0_i32_2 : i32 to vector<1x256xi32>
    %10 = arith.cmpi slt, %6, %9 : vector<1x256xi32>
    %c0_i32_3 = arith.constant 0 : i32
    %11 = arith.cmpi slt, %4, %c0_i32_3 : i32
    %12 = vector.broadcast %11 : i1 to vector<1x256xi1>
    %13 = vector.broadcast %12 : vector<1x256xi1> to vector<1x256xi1>
    %14 = arith.xori %10, %13 : vector<1x256xi1>
    %15 = arith.andi %14, %8 : vector<1x256xi1>
    %16 = vector.broadcast %4 : i32 to vector<1x256xi32>
    %17 = arith.addi %6, %16 : vector<1x256xi32>
    %18 = arith.select %15, %17, %6 : vector<1x256xi1>, vector<1x256xi32>
    %c0_i32_4 = arith.constant 0 : i32
    %19 = vector.broadcast %c0_i32_4 : i32 to vector<1x256xi32>
    %20 = arith.cmpi ne, %18, %19 : vector<1x256xi32>
    %c15_i32 = arith.constant 15 : i32
    %21 = vector.broadcast %c15_i32 : i32 to vector<1x256xi32>
    %22 = arith.cmpi ne, %18, %21 : vector<1x256xi32>
    %c0_5 = arith.constant 0 : index
    %c0_6 = arith.constant 0 : index
    %c0_7 = arith.constant 0 : index
    %23 = vector.load %arg1[%c0_5, %c0_6, %c0_7] : memref<1x16x256xf32, #tpu.memory_space<vmem>>, vector<1x16x256xf32>
    %24 = vector.shape_cast %23 : vector<1x16x256xf32> to vector<16x256xf32>
    %c0_8 = arith.constant 0 : index
    %c128 = arith.constant 128 : index
    %25 = vector.load %arg9[%c0_8, %c128] : memref<16x512xf32, #tpu.memory_space<vmem>>, vector<16x256xf32>
    tpu.vector_store %arg9[%c0_8, %c128], %24 {strides = array<i32>} : memref<16x512xf32, #tpu.memory_space<vmem>>, vector<16x256xf32>,
    %cst_9 = arith.constant 0.000000e+00 : f32
    %26 = vector.broadcast %cst_9 : f32 to vector<16x256xf32>
    %c0_10 = arith.constant 0 : index
    %c111 = arith.constant 111 : index
    %27 = vector.load %arg9[%c0_10, %c111] : memref<16x512xf32, #tpu.memory_space<vmem>>, vector<16x256xf32>
    %cst_11 = arith.constant 0.000000e+00 : f32
    %28 = vector.shape_cast %20 : vector<1x256xi1> to vector<1x256xi1>
    %29 = vector.broadcast %28 : vector<1x256xi1> to vector<16x256xi1>
    %30 = vector.broadcast %cst_11 : f32 to vector<16x256xf32>
    %31 = arith.select %29, %27, %30 : vector<16x256xi1>, vector<16x256xf32>
    %c0_12 = arith.constant 0 : index
    %c0_13 = arith.constant 0 : index
    %c0_14 = arith.constant 0 : index
    %c0_15 = arith.constant 0 : index
    %32 = vector.load %arg2[%c0_12, %c0_13, %c0_14, %c0_15] : memref<3x9x16x16xbf16, #tpu.memory_space<vmem>>, vector<1x1x16x16xbf16>
    %33 = vector.shape_cast %32 : vector<1x1x16x16xbf16> to vector<16x16xbf16>
    %34 = arith.truncf %31 : vector<16x256xf32> to vector<16x256xbf16>
    %cst_16 = arith.constant dense<0.000000e+00> : vector<16x256xf32>
    %35 = tpu.matmul %33, %34, %cst_16 {dimension_numbers = #tpu.dot_dimension_numbers<[1], [0], [0], [1], [0, 0, 1, 1], [], []>} : vector<16x16xbf16>, vector<16x256xbf16>, vector<16x256xf32> -> vector<16x256xf32>
    %36 = arith.addf %26, %35 : vector<16x256xf32>
    %c0_17 = arith.constant 0 : index
    %c112 = arith.constant 112 : index
    %37 = vector.load %arg9[%c0_17, %c112] : memref<16x512xf32, #tpu.memory_space<vmem>>, vector<16x256xf32>
    %c0_18 = arith.constant 0 : index
    %c1 = arith.constant 1 : index
    %c0_19 = arith.constant 0 : index
    %c0_20 = arith.constant 0 : index
    %38 = vector.load %arg2[%c0_18, %c1, %c0_19, %c0_20] : memref<3x9x16x16xbf16, #tpu.memory_space<vmem>>, vector<1x1x16x16xbf16>
    %39 = vector.shape_cast %38 : vector<1x1x16x16xbf16> to vector<16x16xbf16>
    %40 = arith.truncf %37 : vector<16x256xf32> to vector<16x256xbf16>
    %cst_21 = arith.constant dense<0.000000e+00> : vector<16x256xf32>
    %41 = tpu.matmul %39, %40, %cst_21 {dimension_numbers = #tpu.dot_dimension_numbers<[1], [0], [0], [1], [0, 0, 1, 1], [], []>} : vector<16x16xbf16>, vector<16x256xbf16>, vector<16x256xf32> -> vector<16x256xf32>
    %42 = arith.addf %36, %41 : vector<16x256xf32>
    %c0_22 = arith.constant 0 : index
    %c113 = arith.constant 113 : index
    %43 = vector.load %arg9[%c0_22, %c113] : memref<16x512xf32, #tpu.memory_space<vmem>>, vector<16x256xf32>
    %cst_23 = arith.constant 0.000000e+00 : f32
    %44 = vector.shape_cast %22 : vector<1x256xi1> to vector<1x256xi1>
    %45 = vector.broadcast %44 : vector<1x256xi1> to vector<16x256xi1>
    %46 = vector.broadcast %cst_23 : f32 to vector<16x256xf32>
    %47 = arith.select %45, %43, %46 : vector<16x256xi1>, vector<16x256xf32>
    %c0_24 = arith.constant 0 : index
    %c2 = arith.constant 2 : index
    %c0_25 = arith.constant 0 : index
    %c0_26 = arith.constant 0 : index
    %48 = vector.load %arg2[%c0_24, %c2, %c0_25, %c0_26] : memref<3x9x16x16xbf16, #tpu.memory_space<vmem>>, vector<1x1x16x16xbf16>
    %49 = vector.shape_cast %48 : vector<1x1x16x16xbf16> to vector<16x16xbf16>
    %50 = arith.truncf %47 : vector<16x256xf32> to vector<16x256xbf16>
    %cst_27 = arith.constant dense<0.000000e+00> : vector<16x256xf32>
    %51 = tpu.matmul %49, %50, %cst_27 {dimension_numbers = #tpu.dot_dimension_numbers<[1], [0], [0], [1], [0, 0, 1, 1], [], []>} : vector<16x16xbf16>, vector<16x256xbf16>, vector<16x256xf32> -> vector<16x256xf32>
    %52 = arith.addf %42, %51 : vector<16x256xf32>
    %c0_28 = arith.constant 0 : index
    %c127 = arith.constant 127 : index
    %53 = vector.load %arg9[%c0_28, %c127] : memref<16x512xf32, #tpu.memory_space<vmem>>, vector<16x256xf32>
    %cst_29 = arith.constant 0.000000e+00 : f32
    %54 = vector.shape_cast %20 : vector<1x256xi1> to vector<1x256xi1>
    %55 = vector.broadcast %54 : vector<1x256xi1> to vector<16x256xi1>
    %56 = vector.broadcast %cst_29 : f32 to vector<16x256xf32>
    %57 = arith.select %55, %53, %56 : vector<16x256xi1>, vector<16x256xf32>
    %c0_30 = arith.constant 0 : index
    %c3 = arith.constant 3 : index
    %c0_31 = arith.constant 0 : index
    %c0_32 = arith.constant 0 : index
    %58 = vector.load %arg2[%c0_30, %c3, %c0_31, %c0_32] : memref<3x9x16x16xbf16, #tpu.memory_space<vmem>>, vector<1x1x16x16xbf16>
    %59 = vector.shape_cast %58 : vector<1x1x16x16xbf16> to vector<16x16xbf16>
    %60 = arith.truncf %57 : vector<16x256xf32> to vector<16x256xbf16>
    %cst_33 = arith.constant dense<0.000000e+00> : vector<16x256xf32>
    %61 = tpu.matmul %59, %60, %cst_33 {dimension_numbers = #tpu.dot_dimension_numbers<[1], [0], [0], [1], [0, 0, 1, 1], [], []>} : vector<16x16xbf16>, vector<16x256xbf16>, vector<16x256xf32> -> vector<16x256xf32>
    %62 = arith.addf %52, %61 : vector<16x256xf32>
    %c0_34 = arith.constant 0 : index
    %c128_35 = arith.constant 128 : index
    %63 = vector.load %arg9[%c0_34, %c128_35] : memref<16x512xf32, #tpu.memory_space<vmem>>, vector<16x256xf32>
    %c0_36 = arith.constant 0 : index
    %c4 = arith.constant 4 : index
    %c0_37 = arith.constant 0 : index
    %c0_38 = arith.constant 0 : index
    %64 = vector.load %arg2[%c0_36, %c4, %c0_37, %c0_38] : memref<3x9x16x16xbf16, #tpu.memory_space<vmem>>, vector<1x1x16x16xbf16>
    %65 = vector.shape_cast %64 : vector<1x1x16x16xbf16> to vector<16x16xbf16>
    %66 = arith.truncf %63 : vector<16x256xf32> to vector<16x256xbf16>
    %cst_39 = arith.constant dense<0.000000e+00> : vector<16x256xf32>
    %67 = tpu.matmul %65, %66, %cst_39 {dimension_numbers = #tpu.dot_dimension_numbers<[1], [0], [0], [1], [0, 0, 1, 1], [], []>} : vector<16x16xbf16>, vector<16x256xbf16>, vector<16x256xf32> -> vector<16x256xf32>
    %68 = arith.addf %62, %67 : vector<16x256xf32>
    %c0_40 = arith.constant 0 : index
    %c129 = arith.constant 129 : index
    %69 = vector.load %arg9[%c0_40, %c129] : memref<16x512xf32, #tpu.memory_space<vmem>>, vector<16x256xf32>
    %cst_41 = arith.constant 0.000000e+00 : f32
    %70 = vector.shape_cast %22 : vector<1x256xi1> to vector<1x256xi1>
    %71 = vector.broadcast %70 : vector<1x256xi1> to vector<16x256xi1>
    %72 = vector.broadcast %cst_41 : f32 to vector<16x256xf32>
    %73 = arith.select %71, %69, %72 : vector<16x256xi1>, vector<16x256xf32>
    %c0_42 = arith.constant 0 : index
    %c5 = arith.constant 5 : index
    %c0_43 = arith.constant 0 : index
    %c0_44 = arith.constant 0 : index
    %74 = vector.load %arg2[%c0_42, %c5, %c0_43, %c0_44] : memref<3x9x16x16xbf16, #tpu.memory_space<vmem>>, vector<1x1x16x16xbf16>
    %75 = vector.shape_cast %74 : vector<1x1x16x16xbf16> to vector<16x16xbf16>
    %76 = arith.truncf %73 : vector<16x256xf32> to vector<16x256xbf16>
    %cst_45 = arith.constant dense<0.000000e+00> : vector<16x256xf32>
    %77 = tpu.matmul %75, %76, %cst_45 {dimension_numbers = #tpu.dot_dimension_numbers<[1], [0], [0], [1], [0, 0, 1, 1], [], []>} : vector<16x16xbf16>, vector<16x256xbf16>, vector<16x256xf32> -> vector<16x256xf32>
    %78 = arith.addf %68, %77 : vector<16x256xf32>
    %c0_46 = arith.constant 0 : index
    %c143 = arith.constant 143 : index
    %79 = vector.load %arg9[%c0_46, %c143] : memref<16x512xf32, #tpu.memory_space<vmem>>, vector<16x256xf32>
    %cst_47 = arith.constant 0.000000e+00 : f32
    %80 = vector.shape_cast %20 : vector<1x256xi1> to vector<1x256xi1>
    %81 = vector.broadcast %80 : vector<1x256xi1> to vector<16x256xi1>
    %82 = vector.broadcast %cst_47 : f32 to vector<16x256xf32>
    %83 = arith.select %81, %79, %82 : vector<16x256xi1>, vector<16x256xf32>
    %c0_48 = arith.constant 0 : index
    %c6 = arith.constant 6 : index
    %c0_49 = arith.constant 0 : index
    %c0_50 = arith.constant 0 : index
    %84 = vector.load %arg2[%c0_48, %c6, %c0_49, %c0_50] : memref<3x9x16x16xbf16, #tpu.memory_space<vmem>>, vector<1x1x16x16xbf16>
    %85 = vector.shape_cast %84 : vector<1x1x16x16xbf16> to vector<16x16xbf16>
    %86 = arith.truncf %83 : vector<16x256xf32> to vector<16x256xbf16>
    %cst_51 = arith.constant dense<0.000000e+00> : vector<16x256xf32>
    %87 = tpu.matmul %85, %86, %cst_51 {dimension_numbers = #tpu.dot_dimension_numbers<[1], [0], [0], [1], [0, 0, 1, 1], [], []>} : vector<16x16xbf16>, vector<16x256xbf16>, vector<16x256xf32> -> vector<16x256xf32>
    %88 = arith.addf %78, %87 : vector<16x256xf32>
    %c0_52 = arith.constant 0 : index
    %c144 = arith.constant 144 : index
    %89 = vector.load %arg9[%c0_52, %c144] : memref<16x512xf32, #tpu.memory_space<vmem>>, vector<16x256xf32>
    %c0_53 = arith.constant 0 : index
    %c7 = arith.constant 7 : index
    %c0_54 = arith.constant 0 : index
    %c0_55 = arith.constant 0 : index
    %90 = vector.load %arg2[%c0_53, %c7, %c0_54, %c0_55] : memref<3x9x16x16xbf16, #tpu.memory_space<vmem>>, vector<1x1x16x16xbf16>
    %91 = vector.shape_cast %90 : vector<1x1x16x16xbf16> to vector<16x16xbf16>
    %92 = arith.truncf %89 : vector<16x256xf32> to vector<16x256xbf16>
    %cst_56 = arith.constant dense<0.000000e+00> : vector<16x256xf32>
    %93 = tpu.matmul %91, %92, %cst_56 {dimension_numbers = #tpu.dot_dimension_numbers<[1], [0], [0], [1], [0, 0, 1, 1], [], []>} : vector<16x16xbf16>, vector<16x256xbf16>, vector<16x256xf32> -> vector<16x256xf32>
    %94 = arith.addf %88, %93 : vector<16x256xf32>
    %c0_57 = arith.constant 0 : index
    %c145 = arith.constant 145 : index
    %95 = vector.load %arg9[%c0_57, %c145] : memref<16x512xf32, #tpu.memory_space<vmem>>, vector<16x256xf32>
    %cst_58 = arith.constant 0.000000e+00 : f32
    %96 = vector.shape_cast %22 : vector<1x256xi1> to vector<1x256xi1>
    %97 = vector.broadcast %96 : vector<1x256xi1> to vector<16x256xi1>
    %98 = vector.broadcast %cst_58 : f32 to vector<16x256xf32>
    %99 = arith.select %97, %95, %98 : vector<16x256xi1>, vector<16x256xf32>
    %c0_59 = arith.constant 0 : index
    %c8 = arith.constant 8 : index
    %c0_60 = arith.constant 0 : index
    %c0_61 = arith.constant 0 : index
    %100 = vector.load %arg2[%c0_59, %c8, %c0_60, %c0_61] : memref<3x9x16x16xbf16, #tpu.memory_space<vmem>>, vector<1x1x16x16xbf16>
    %101 = vector.shape_cast %100 : vector<1x1x16x16xbf16> to vector<16x16xbf16>
    %102 = arith.truncf %99 : vector<16x256xf32> to vector<16x256xbf16>
    %cst_62 = arith.constant dense<0.000000e+00> : vector<16x256xf32>
    %103 = tpu.matmul %101, %102, %cst_62 {dimension_numbers = #tpu.dot_dimension_numbers<[1], [0], [0], [1], [0, 0, 1, 1], [], []>} : vector<16x16xbf16>, vector<16x256xbf16>, vector<16x256xf32> -> vector<16x256xf32>
    %104 = arith.addf %94, %103 : vector<16x256xf32>
    %c0_63 = arith.constant 0 : index
    %c0_64 = arith.constant 0 : index
    %c0_65 = arith.constant 0 : index
    %105 = vector.load %arg3[%c0_63, %c0_64, %c0_65] : memref<3x16x1xf32, #tpu.memory_space<vmem>>, vector<1x16x1xf32>
    %106 = vector.shape_cast %105 : vector<1x16x1xf32> to vector<16x1xf32>
    %107 = vector.broadcast %106 : vector<16x1xf32> to vector<16x256xf32>
    %108 = arith.addf %104, %107 : vector<16x256xf32>
    %cst_66 = arith.constant 0.000000e+00 : f32
    %109 = vector.broadcast %cst_66 : f32 to vector<16x256xf32>
    %110 = arith.maximumf %108, %109 : vector<16x256xf32>
    %c0_67 = arith.constant 0 : index
    %c128_68 = arith.constant 128 : index
    %111 = vector.load %arg9[%c0_67, %c128_68] : memref<16x512xf32, #tpu.memory_space<vmem>>, vector<16x256xf32>
    tpu.vector_store %arg9[%c0_67, %c128_68], %110 {strides = array<i32>} : memref<16x512xf32, #tpu.memory_space<vmem>>, vector<16x256xf32>,
    %cst_69 = arith.constant 0.000000e+00 : f32
    %112 = vector.broadcast %cst_69 : f32 to vector<16x256xf32>
    %c0_70 = arith.constant 0 : index
    %c111_71 = arith.constant 111 : index
    %113 = vector.load %arg9[%c0_70, %c111_71] : memref<16x512xf32, #tpu.memory_space<vmem>>, vector<16x256xf32>
    %cst_72 = arith.constant 0.000000e+00 : f32
    %114 = vector.shape_cast %20 : vector<1x256xi1> to vector<1x256xi1>
    %115 = vector.broadcast %114 : vector<1x256xi1> to vector<16x256xi1>
    %116 = vector.broadcast %cst_72 : f32 to vector<16x256xf32>
    %117 = arith.select %115, %113, %116 : vector<16x256xi1>, vector<16x256xf32>
    %c1_73 = arith.constant 1 : index
    %c0_74 = arith.constant 0 : index
    %c0_75 = arith.constant 0 : index
    %c0_76 = arith.constant 0 : index
    %118 = vector.load %arg2[%c1_73, %c0_74, %c0_75, %c0_76] : memref<3x9x16x16xbf16, #tpu.memory_space<vmem>>, vector<1x1x16x16xbf16>
    %119 = vector.shape_cast %118 : vector<1x1x16x16xbf16> to vector<16x16xbf16>
    %120 = arith.truncf %117 : vector<16x256xf32> to vector<16x256xbf16>
    %cst_77 = arith.constant dense<0.000000e+00> : vector<16x256xf32>
    %121 = tpu.matmul %119, %120, %cst_77 {dimension_numbers = #tpu.dot_dimension_numbers<[1], [0], [0], [1], [0, 0, 1, 1], [], []>} : vector<16x16xbf16>, vector<16x256xbf16>, vector<16x256xf32> -> vector<16x256xf32>
    %122 = arith.addf %112, %121 : vector<16x256xf32>
    %c0_78 = arith.constant 0 : index
    %c112_79 = arith.constant 112 : index
    %123 = vector.load %arg9[%c0_78, %c112_79] : memref<16x512xf32, #tpu.memory_space<vmem>>, vector<16x256xf32>
    %c1_80 = arith.constant 1 : index
    %c1_81 = arith.constant 1 : index
    %c0_82 = arith.constant 0 : index
    %c0_83 = arith.constant 0 : index
    %124 = vector.load %arg2[%c1_80, %c1_81, %c0_82, %c0_83] : memref<3x9x16x16xbf16, #tpu.memory_space<vmem>>, vector<1x1x16x16xbf16>
    %125 = vector.shape_cast %124 : vector<1x1x16x16xbf16> to vector<16x16xbf16>
    %126 = arith.truncf %123 : vector<16x256xf32> to vector<16x256xbf16>
    %cst_84 = arith.constant dense<0.000000e+00> : vector<16x256xf32>
    %127 = tpu.matmul %125, %126, %cst_84 {dimension_numbers = #tpu.dot_dimension_numbers<[1], [0], [0], [1], [0, 0, 1, 1], [], []>} : vector<16x16xbf16>, vector<16x256xbf16>, vector<16x256xf32> -> vector<16x256xf32>
    %128 = arith.addf %122, %127 : vector<16x256xf32>
    %c0_85 = arith.constant 0 : index
    %c113_86 = arith.constant 113 : index
    %129 = vector.load %arg9[%c0_85, %c113_86] : memref<16x512xf32, #tpu.memory_space<vmem>>, vector<16x256xf32>
    %cst_87 = arith.constant 0.000000e+00 : f32
    %130 = vector.shape_cast %22 : vector<1x256xi1> to vector<1x256xi1>
    %131 = vector.broadcast %130 : vector<1x256xi1> to vector<16x256xi1>
    %132 = vector.broadcast %cst_87 : f32 to vector<16x256xf32>
    %133 = arith.select %131, %129, %132 : vector<16x256xi1>, vector<16x256xf32>
    %c1_88 = arith.constant 1 : index
    %c2_89 = arith.constant 2 : index
    %c0_90 = arith.constant 0 : index
    %c0_91 = arith.constant 0 : index
    %134 = vector.load %arg2[%c1_88, %c2_89, %c0_90, %c0_91] : memref<3x9x16x16xbf16, #tpu.memory_space<vmem>>, vector<1x1x16x16xbf16>
    %135 = vector.shape_cast %134 : vector<1x1x16x16xbf16> to vector<16x16xbf16>
    %136 = arith.truncf %133 : vector<16x256xf32> to vector<16x256xbf16>
    %cst_92 = arith.constant dense<0.000000e+00> : vector<16x256xf32>
    %137 = tpu.matmul %135, %136, %cst_92 {dimension_numbers = #tpu.dot_dimension_numbers<[1], [0], [0], [1], [0, 0, 1, 1], [], []>} : vector<16x16xbf16>, vector<16x256xbf16>, vector<16x256xf32> -> vector<16x256xf32>
    %138 = arith.addf %128, %137 : vector<16x256xf32>
    %c0_93 = arith.constant 0 : index
    %c127_94 = arith.constant 127 : index
    %139 = vector.load %arg9[%c0_93, %c127_94] : memref<16x512xf32, #tpu.memory_space<vmem>>, vector<16x256xf32>
    %cst_95 = arith.constant 0.000000e+00 : f32
    %140 = vector.shape_cast %20 : vector<1x256xi1> to vector<1x256xi1>
    %141 = vector.broadcast %140 : vector<1x256xi1> to vector<16x256xi1>
    %142 = vector.broadcast %cst_95 : f32 to vector<16x256xf32>
    %143 = arith.select %141, %139, %142 : vector<16x256xi1>, vector<16x256xf32>
    %c1_96 = arith.constant 1 : index
    %c3_97 = arith.constant 3 : index
    %c0_98 = arith.constant 0 : index
    %c0_99 = arith.constant 0 : index
    %144 = vector.load %arg2[%c1_96, %c3_97, %c0_98, %c0_99] : memref<3x9x16x16xbf16, #tpu.memory_space<vmem>>, vector<1x1x16x16xbf16>
    %145 = vector.shape_cast %144 : vector<1x1x16x16xbf16> to vector<16x16xbf16>
    %146 = arith.truncf %143 : vector<16x256xf32> to vector<16x256xbf16>
    %cst_100 = arith.constant dense<0.000000e+00> : vector<16x256xf32>
    %147 = tpu.matmul %145, %146, %cst_100 {dimension_numbers = #tpu.dot_dimension_numbers<[1], [0], [0], [1], [0, 0, 1, 1], [], []>} : vector<16x16xbf16>, vector<16x256xbf16>, vector<16x256xf32> -> vector<16x256xf32>
    %148 = arith.addf %138, %147 : vector<16x256xf32>
    %c0_101 = arith.constant 0 : index
    %c128_102 = arith.constant 128 : index
    %149 = vector.load %arg9[%c0_101, %c128_102] : memref<16x512xf32, #tpu.memory_space<vmem>>, vector<16x256xf32>
    %c1_103 = arith.constant 1 : index
    %c4_104 = arith.constant 4 : index
    %c0_105 = arith.constant 0 : index
    %c0_106 = arith.constant 0 : index
    %150 = vector.load %arg2[%c1_103, %c4_104, %c0_105, %c0_106] : memref<3x9x16x16xbf16, #tpu.memory_space<vmem>>, vector<1x1x16x16xbf16>
    %151 = vector.shape_cast %150 : vector<1x1x16x16xbf16> to vector<16x16xbf16>
    %152 = arith.truncf %149 : vector<16x256xf32> to vector<16x256xbf16>
    %cst_107 = arith.constant dense<0.000000e+00> : vector<16x256xf32>
    %153 = tpu.matmul %151, %152, %cst_107 {dimension_numbers = #tpu.dot_dimension_numbers<[1], [0], [0], [1], [0, 0, 1, 1], [], []>} : vector<16x16xbf16>, vector<16x256xbf16>, vector<16x256xf32> -> vector<16x256xf32>
    %154 = arith.addf %148, %153 : vector<16x256xf32>
    %c0_108 = arith.constant 0 : index
    %c129_109 = arith.constant 129 : index
    %155 = vector.load %arg9[%c0_108, %c129_109] : memref<16x512xf32, #tpu.memory_space<vmem>>, vector<16x256xf32>
    %cst_110 = arith.constant 0.000000e+00 : f32
    %156 = vector.shape_cast %22 : vector<1x256xi1> to vector<1x256xi1>
    %157 = vector.broadcast %156 : vector<1x256xi1> to vector<16x256xi1>
    %158 = vector.broadcast %cst_110 : f32 to vector<16x256xf32>
    %159 = arith.select %157, %155, %158 : vector<16x256xi1>, vector<16x256xf32>
    %c1_111 = arith.constant 1 : index
    %c5_112 = arith.constant 5 : index
    %c0_113 = arith.constant 0 : index
    %c0_114 = arith.constant 0 : index
    %160 = vector.load %arg2[%c1_111, %c5_112, %c0_113, %c0_114] : memref<3x9x16x16xbf16, #tpu.memory_space<vmem>>, vector<1x1x16x16xbf16>
    %161 = vector.shape_cast %160 : vector<1x1x16x16xbf16> to vector<16x16xbf16>
    %162 = arith.truncf %159 : vector<16x256xf32> to vector<16x256xbf16>
    %cst_115 = arith.constant dense<0.000000e+00> : vector<16x256xf32>
    %163 = tpu.matmul %161, %162, %cst_115 {dimension_numbers = #tpu.dot_dimension_numbers<[1], [0], [0], [1], [0, 0, 1, 1], [], []>} : vector<16x16xbf16>, vector<16x256xbf16>, vector<16x256xf32> -> vector<16x256xf32>
    %164 = arith.addf %154, %163 : vector<16x256xf32>
    %c0_116 = arith.constant 0 : index
    %c143_117 = arith.constant 143 : index
    %165 = vector.load %arg9[%c0_116, %c143_117] : memref<16x512xf32, #tpu.memory_space<vmem>>, vector<16x256xf32>
    %cst_118 = arith.constant 0.000000e+00 : f32
    %166 = vector.shape_cast %20 : vector<1x256xi1> to vector<1x256xi1>
    %167 = vector.broadcast %166 : vector<1x256xi1> to vector<16x256xi1>
    %168 = vector.broadcast %cst_118 : f32 to vector<16x256xf32>
    %169 = arith.select %167, %165, %168 : vector<16x256xi1>, vector<16x256xf32>
    %c1_119 = arith.constant 1 : index
    %c6_120 = arith.constant 6 : index
    %c0_121 = arith.constant 0 : index
    %c0_122 = arith.constant 0 : index
    %170 = vector.load %arg2[%c1_119, %c6_120, %c0_121, %c0_122] : memref<3x9x16x16xbf16, #tpu.memory_space<vmem>>, vector<1x1x16x16xbf16>
    %171 = vector.shape_cast %170 : vector<1x1x16x16xbf16> to vector<16x16xbf16>
    %172 = arith.truncf %169 : vector<16x256xf32> to vector<16x256xbf16>
    %cst_123 = arith.constant dense<0.000000e+00> : vector<16x256xf32>
    %173 = tpu.matmul %171, %172, %cst_123 {dimension_numbers = #tpu.dot_dimension_numbers<[1], [0], [0], [1], [0, 0, 1, 1], [], []>} : vector<16x16xbf16>, vector<16x256xbf16>, vector<16x256xf32> -> vector<16x256xf32>
    %174 = arith.addf %164, %173 : vector<16x256xf32>
    %c0_124 = arith.constant 0 : index
    %c144_125 = arith.constant 144 : index
    %175 = vector.load %arg9[%c0_124, %c144_125] : memref<16x512xf32, #tpu.memory_space<vmem>>, vector<16x256xf32>
    %c1_126 = arith.constant 1 : index
    %c7_127 = arith.constant 7 : index
    %c0_128 = arith.constant 0 : index
    %c0_129 = arith.constant 0 : index
    %176 = vector.load %arg2[%c1_126, %c7_127, %c0_128, %c0_129] : memref<3x9x16x16xbf16, #tpu.memory_space<vmem>>, vector<1x1x16x16xbf16>
    %177 = vector.shape_cast %176 : vector<1x1x16x16xbf16> to vector<16x16xbf16>
    %178 = arith.truncf %175 : vector<16x256xf32> to vector<16x256xbf16>
    %cst_130 = arith.constant dense<0.000000e+00> : vector<16x256xf32>
    %179 = tpu.matmul %177, %178, %cst_130 {dimension_numbers = #tpu.dot_dimension_numbers<[1], [0], [0], [1], [0, 0, 1, 1], [], []>} : vector<16x16xbf16>, vector<16x256xbf16>, vector<16x256xf32> -> vector<16x256xf32>
    %180 = arith.addf %174, %179 : vector<16x256xf32>
    %c0_131 = arith.constant 0 : index
    %c145_132 = arith.constant 145 : index
    %181 = vector.load %arg9[%c0_131, %c145_132] : memref<16x512xf32, #tpu.memory_space<vmem>>, vector<16x256xf32>
    %cst_133 = arith.constant 0.000000e+00 : f32
    %182 = vector.shape_cast %22 : vector<1x256xi1> to vector<1x256xi1>
    %183 = vector.broadcast %182 : vector<1x256xi1> to vector<16x256xi1>
    %184 = vector.broadcast %cst_133 : f32 to vector<16x256xf32>
    %185 = arith.select %183, %181, %184 : vector<16x256xi1>, vector<16x256xf32>
    %c1_134 = arith.constant 1 : index
    %c8_135 = arith.constant 8 : index
    %c0_136 = arith.constant 0 : index
    %c0_137 = arith.constant 0 : index
    %186 = vector.load %arg2[%c1_134, %c8_135, %c0_136, %c0_137] : memref<3x9x16x16xbf16, #tpu.memory_space<vmem>>, vector<1x1x16x16xbf16>
    %187 = vector.shape_cast %186 : vector<1x1x16x16xbf16> to vector<16x16xbf16>
    %188 = arith.truncf %185 : vector<16x256xf32> to vector<16x256xbf16>
    %cst_138 = arith.constant dense<0.000000e+00> : vector<16x256xf32>
    %189 = tpu.matmul %187, %188, %cst_138 {dimension_numbers = #tpu.dot_dimension_numbers<[1], [0], [0], [1], [0, 0, 1, 1], [], []>} : vector<16x16xbf16>, vector<16x256xbf16>, vector<16x256xf32> -> vector<16x256xf32>
    %190 = arith.addf %180, %189 : vector<16x256xf32>
    %c1_139 = arith.constant 1 : index
    %c0_140 = arith.constant 0 : index
    %c0_141 = arith.constant 0 : index
    %191 = vector.load %arg3[%c1_139, %c0_140, %c0_141] : memref<3x16x1xf32, #tpu.memory_space<vmem>>, vector<1x16x1xf32>
    %192 = vector.shape_cast %191 : vector<1x16x1xf32> to vector<16x1xf32>
    %193 = vector.broadcast %192 : vector<16x1xf32> to vector<16x256xf32>
    %194 = arith.addf %190, %193 : vector<16x256xf32>
    %cst_142 = arith.constant 0.000000e+00 : f32
    %195 = vector.broadcast %cst_142 : f32 to vector<16x256xf32>
    %196 = arith.maximumf %194, %195 : vector<16x256xf32>
    %c0_143 = arith.constant 0 : index
    %c128_144 = arith.constant 128 : index
    %197 = vector.load %arg9[%c0_143, %c128_144] : memref<16x512xf32, #tpu.memory_space<vmem>>, vector<16x256xf32>
    tpu.vector_store %arg9[%c0_143, %c128_144], %196 {strides = array<i32>} : memref<16x512xf32, #tpu.memory_space<vmem>>, vector<16x256xf32>,
    %cst_145 = arith.constant 0.000000e+00 : f32
    %198 = vector.broadcast %cst_145 : f32 to vector<16x256xf32>
    %c0_146 = arith.constant 0 : index
    %c111_147 = arith.constant 111 : index
    %199 = vector.load %arg9[%c0_146, %c111_147] : memref<16x512xf32, #tpu.memory_space<vmem>>, vector<16x256xf32>
    %cst_148 = arith.constant 0.000000e+00 : f32
    %200 = vector.shape_cast %20 : vector<1x256xi1> to vector<1x256xi1>
    %201 = vector.broadcast %200 : vector<1x256xi1> to vector<16x256xi1>
    %202 = vector.broadcast %cst_148 : f32 to vector<16x256xf32>
    %203 = arith.select %201, %199, %202 : vector<16x256xi1>, vector<16x256xf32>
    %c2_149 = arith.constant 2 : index
    %c0_150 = arith.constant 0 : index
    %c0_151 = arith.constant 0 : index
    %c0_152 = arith.constant 0 : index
    %204 = vector.load %arg2[%c2_149, %c0_150, %c0_151, %c0_152] : memref<3x9x16x16xbf16, #tpu.memory_space<vmem>>, vector<1x1x16x16xbf16>
    %205 = vector.shape_cast %204 : vector<1x1x16x16xbf16> to vector<16x16xbf16>
    %206 = arith.truncf %203 : vector<16x256xf32> to vector<16x256xbf16>
    %cst_153 = arith.constant dense<0.000000e+00> : vector<16x256xf32>
    %207 = tpu.matmul %205, %206, %cst_153 {dimension_numbers = #tpu.dot_dimension_numbers<[1], [0], [0], [1], [0, 0, 1, 1], [], []>} : vector<16x16xbf16>, vector<16x256xbf16>, vector<16x256xf32> -> vector<16x256xf32>
    %208 = arith.addf %198, %207 : vector<16x256xf32>
    %c0_154 = arith.constant 0 : index
    %c112_155 = arith.constant 112 : index
    %209 = vector.load %arg9[%c0_154, %c112_155] : memref<16x512xf32, #tpu.memory_space<vmem>>, vector<16x256xf32>
    %c2_156 = arith.constant 2 : index
    %c1_157 = arith.constant 1 : index
    %c0_158 = arith.constant 0 : index
    %c0_159 = arith.constant 0 : index
    %210 = vector.load %arg2[%c2_156, %c1_157, %c0_158, %c0_159] : memref<3x9x16x16xbf16, #tpu.memory_space<vmem>>, vector<1x1x16x16xbf16>
    %211 = vector.shape_cast %210 : vector<1x1x16x16xbf16> to vector<16x16xbf16>
    %212 = arith.truncf %209 : vector<16x256xf32> to vector<16x256xbf16>
    %cst_160 = arith.constant dense<0.000000e+00> : vector<16x256xf32>
    %213 = tpu.matmul %211, %212, %cst_160 {dimension_numbers = #tpu.dot_dimension_numbers<[1], [0], [0], [1], [0, 0, 1, 1], [], []>} : vector<16x16xbf16>, vector<16x256xbf16>, vector<16x256xf32> -> vector<16x256xf32>
    %214 = arith.addf %208, %213 : vector<16x256xf32>
    %c0_161 = arith.constant 0 : index
    %c113_162 = arith.constant 113 : index
    %215 = vector.load %arg9[%c0_161, %c113_162] : memref<16x512xf32, #tpu.memory_space<vmem>>, vector<16x256xf32>
    %cst_163 = arith.constant 0.000000e+00 : f32
    %216 = vector.shape_cast %22 : vector<1x256xi1> to vector<1x256xi1>
    %217 = vector.broadcast %216 : vector<1x256xi1> to vector<16x256xi1>
    %218 = vector.broadcast %cst_163 : f32 to vector<16x256xf32>
    %219 = arith.select %217, %215, %218 : vector<16x256xi1>, vector<16x256xf32>
    %c2_164 = arith.constant 2 : index
    %c2_165 = arith.constant 2 : index
    %c0_166 = arith.constant 0 : index
    %c0_167 = arith.constant 0 : index
    %220 = vector.load %arg2[%c2_164, %c2_165, %c0_166, %c0_167] : memref<3x9x16x16xbf16, #tpu.memory_space<vmem>>, vector<1x1x16x16xbf16>
    %221 = vector.shape_cast %220 : vector<1x1x16x16xbf16> to vector<16x16xbf16>
    %222 = arith.truncf %219 : vector<16x256xf32> to vector<16x256xbf16>
    %cst_168 = arith.constant dense<0.000000e+00> : vector<16x256xf32>
    %223 = tpu.matmul %221, %222, %cst_168 {dimension_numbers = #tpu.dot_dimension_numbers<[1], [0], [0], [1], [0, 0, 1, 1], [], []>} : vector<16x16xbf16>, vector<16x256xbf16>, vector<16x256xf32> -> vector<16x256xf32>
    %224 = arith.addf %214, %223 : vector<16x256xf32>
    %c0_169 = arith.constant 0 : index
    %c127_170 = arith.constant 127 : index
    %225 = vector.load %arg9[%c0_169, %c127_170] : memref<16x512xf32, #tpu.memory_space<vmem>>, vector<16x256xf32>
    %cst_171 = arith.constant 0.000000e+00 : f32
    %226 = vector.shape_cast %20 : vector<1x256xi1> to vector<1x256xi1>
    %227 = vector.broadcast %226 : vector<1x256xi1> to vector<16x256xi1>
    %228 = vector.broadcast %cst_171 : f32 to vector<16x256xf32>
    %229 = arith.select %227, %225, %228 : vector<16x256xi1>, vector<16x256xf32>
    %c2_172 = arith.constant 2 : index
    %c3_173 = arith.constant 3 : index
    %c0_174 = arith.constant 0 : index
    %c0_175 = arith.constant 0 : index
    %230 = vector.load %arg2[%c2_172, %c3_173, %c0_174, %c0_175] : memref<3x9x16x16xbf16, #tpu.memory_space<vmem>>, vector<1x1x16x16xbf16>
    %231 = vector.shape_cast %230 : vector<1x1x16x16xbf16> to vector<16x16xbf16>
    %232 = arith.truncf %229 : vector<16x256xf32> to vector<16x256xbf16>
    %cst_176 = arith.constant dense<0.000000e+00> : vector<16x256xf32>
    %233 = tpu.matmul %231, %232, %cst_176 {dimension_numbers = #tpu.dot_dimension_numbers<[1], [0], [0], [1], [0, 0, 1, 1], [], []>} : vector<16x16xbf16>, vector<16x256xbf16>, vector<16x256xf32> -> vector<16x256xf32>
    %234 = arith.addf %224, %233 : vector<16x256xf32>
    %c0_177 = arith.constant 0 : index
    %c128_178 = arith.constant 128 : index
    %235 = vector.load %arg9[%c0_177, %c128_178] : memref<16x512xf32, #tpu.memory_space<vmem>>, vector<16x256xf32>
    %c2_179 = arith.constant 2 : index
    %c4_180 = arith.constant 4 : index
    %c0_181 = arith.constant 0 : index
    %c0_182 = arith.constant 0 : index
    %236 = vector.load %arg2[%c2_179, %c4_180, %c0_181, %c0_182] : memref<3x9x16x16xbf16, #tpu.memory_space<vmem>>, vector<1x1x16x16xbf16>
    %237 = vector.shape_cast %236 : vector<1x1x16x16xbf16> to vector<16x16xbf16>
    %238 = arith.truncf %235 : vector<16x256xf32> to vector<16x256xbf16>
    %cst_183 = arith.constant dense<0.000000e+00> : vector<16x256xf32>
    %239 = tpu.matmul %237, %238, %cst_183 {dimension_numbers = #tpu.dot_dimension_numbers<[1], [0], [0], [1], [0, 0, 1, 1], [], []>} : vector<16x16xbf16>, vector<16x256xbf16>, vector<16x256xf32> -> vector<16x256xf32>
    %240 = arith.addf %234, %239 : vector<16x256xf32>
    %c0_184 = arith.constant 0 : index
    %c129_185 = arith.constant 129 : index
    %241 = vector.load %arg9[%c0_184, %c129_185] : memref<16x512xf32, #tpu.memory_space<vmem>>, vector<16x256xf32>
    %cst_186 = arith.constant 0.000000e+00 : f32
    %242 = vector.shape_cast %22 : vector<1x256xi1> to vector<1x256xi1>
    %243 = vector.broadcast %242 : vector<1x256xi1> to vector<16x256xi1>
    %244 = vector.broadcast %cst_186 : f32 to vector<16x256xf32>
    %245 = arith.select %243, %241, %244 : vector<16x256xi1>, vector<16x256xf32>
    %c2_187 = arith.constant 2 : index
    %c5_188 = arith.constant 5 : index
    %c0_189 = arith.constant 0 : index
    %c0_190 = arith.constant 0 : index
    %246 = vector.load %arg2[%c2_187, %c5_188, %c0_189, %c0_190] : memref<3x9x16x16xbf16, #tpu.memory_space<vmem>>, vector<1x1x16x16xbf16>
    %247 = vector.shape_cast %246 : vector<1x1x16x16xbf16> to vector<16x16xbf16>
    %248 = arith.truncf %245 : vector<16x256xf32> to vector<16x256xbf16>
    %cst_191 = arith.constant dense<0.000000e+00> : vector<16x256xf32>
    %249 = tpu.matmul %247, %248, %cst_191 {dimension_numbers = #tpu.dot_dimension_numbers<[1], [0], [0], [1], [0, 0, 1, 1], [], []>} : vector<16x16xbf16>, vector<16x256xbf16>, vector<16x256xf32> -> vector<16x256xf32>
    %250 = arith.addf %240, %249 : vector<16x256xf32>
    %c0_192 = arith.constant 0 : index
    %c143_193 = arith.constant 143 : index
    %251 = vector.load %arg9[%c0_192, %c143_193] : memref<16x512xf32, #tpu.memory_space<vmem>>, vector<16x256xf32>
    %cst_194 = arith.constant 0.000000e+00 : f32
    %252 = vector.shape_cast %20 : vector<1x256xi1> to vector<1x256xi1>
    %253 = vector.broadcast %252 : vector<1x256xi1> to vector<16x256xi1>
    %254 = vector.broadcast %cst_194 : f32 to vector<16x256xf32>
    %255 = arith.select %253, %251, %254 : vector<16x256xi1>, vector<16x256xf32>
    %c2_195 = arith.constant 2 : index
    %c6_196 = arith.constant 6 : index
    %c0_197 = arith.constant 0 : index
    %c0_198 = arith.constant 0 : index
    %256 = vector.load %arg2[%c2_195, %c6_196, %c0_197, %c0_198] : memref<3x9x16x16xbf16, #tpu.memory_space<vmem>>, vector<1x1x16x16xbf16>
    %257 = vector.shape_cast %256 : vector<1x1x16x16xbf16> to vector<16x16xbf16>
    %258 = arith.truncf %255 : vector<16x256xf32> to vector<16x256xbf16>
    %cst_199 = arith.constant dense<0.000000e+00> : vector<16x256xf32>
    %259 = tpu.matmul %257, %258, %cst_199 {dimension_numbers = #tpu.dot_dimension_numbers<[1], [0], [0], [1], [0, 0, 1, 1], [], []>} : vector<16x16xbf16>, vector<16x256xbf16>, vector<16x256xf32> -> vector<16x256xf32>
    %260 = arith.addf %250, %259 : vector<16x256xf32>
    %c0_200 = arith.constant 0 : index
    %c144_201 = arith.constant 144 : index
    %261 = vector.load %arg9[%c0_200, %c144_201] : memref<16x512xf32, #tpu.memory_space<vmem>>, vector<16x256xf32>
    %c2_202 = arith.constant 2 : index
    %c7_203 = arith.constant 7 : index
    %c0_204 = arith.constant 0 : index
    %c0_205 = arith.constant 0 : index
    %262 = vector.load %arg2[%c2_202, %c7_203, %c0_204, %c0_205] : memref<3x9x16x16xbf16, #tpu.memory_space<vmem>>, vector<1x1x16x16xbf16>
    %263 = vector.shape_cast %262 : vector<1x1x16x16xbf16> to vector<16x16xbf16>
    %264 = arith.truncf %261 : vector<16x256xf32> to vector<16x256xbf16>
    %cst_206 = arith.constant dense<0.000000e+00> : vector<16x256xf32>
    %265 = tpu.matmul %263, %264, %cst_206 {dimension_numbers = #tpu.dot_dimension_numbers<[1], [0], [0], [1], [0, 0, 1, 1], [], []>} : vector<16x16xbf16>, vector<16x256xbf16>, vector<16x256xf32> -> vector<16x256xf32>
    %266 = arith.addf %260, %265 : vector<16x256xf32>
    %c0_207 = arith.constant 0 : index
    %c145_208 = arith.constant 145 : index
    %267 = vector.load %arg9[%c0_207, %c145_208] : memref<16x512xf32, #tpu.memory_space<vmem>>, vector<16x256xf32>
    %cst_209 = arith.constant 0.000000e+00 : f32
    %268 = vector.shape_cast %22 : vector<1x256xi1> to vector<1x256xi1>
    %269 = vector.broadcast %268 : vector<1x256xi1> to vector<16x256xi1>
    %270 = vector.broadcast %cst_209 : f32 to vector<16x256xf32>
    %271 = arith.select %269, %267, %270 : vector<16x256xi1>, vector<16x256xf32>
    %c2_210 = arith.constant 2 : index
    %c8_211 = arith.constant 8 : index
    %c0_212 = arith.constant 0 : index
    %c0_213 = arith.constant 0 : index
    %272 = vector.load %arg2[%c2_210, %c8_211, %c0_212, %c0_213] : memref<3x9x16x16xbf16, #tpu.memory_space<vmem>>, vector<1x1x16x16xbf16>
    %273 = vector.shape_cast %272 : vector<1x1x16x16xbf16> to vector<16x16xbf16>
    %274 = arith.truncf %271 : vector<16x256xf32> to vector<16x256xbf16>
    %cst_214 = arith.constant dense<0.000000e+00> : vector<16x256xf32>
    %275 = tpu.matmul %273, %274, %cst_214 {dimension_numbers = #tpu.dot_dimension_numbers<[1], [0], [0], [1], [0, 0, 1, 1], [], []>} : vector<16x16xbf16>, vector<16x256xbf16>, vector<16x256xf32> -> vector<16x256xf32>
    %276 = arith.addf %266, %275 : vector<16x256xf32>
    %c2_215 = arith.constant 2 : index
    %c0_216 = arith.constant 0 : index
    %c0_217 = arith.constant 0 : index
    %277 = vector.load %arg3[%c2_215, %c0_216, %c0_217] : memref<3x16x1xf32, #tpu.memory_space<vmem>>, vector<1x16x1xf32>
    %278 = vector.shape_cast %277 : vector<1x16x1xf32> to vector<16x1xf32>
    %279 = vector.broadcast %278 : vector<16x1xf32> to vector<16x256xf32>
    %280 = arith.addf %276, %279 : vector<16x256xf32>
    %cst_218 = arith.constant 0.000000e+00 : f32
    %281 = vector.broadcast %cst_218 : f32 to vector<16x256xf32>
    %282 = arith.maximumf %280, %281 : vector<16x256xf32>
    %c0_219 = arith.constant 0 : index
    %c128_220 = arith.constant 128 : index
    %283 = vector.load %arg9[%c0_219, %c128_220] : memref<16x512xf32, #tpu.memory_space<vmem>>, vector<16x256xf32>
    tpu.vector_store %arg9[%c0_219, %c128_220], %282 {strides = array<i32>} : memref<16x512xf32, #tpu.memory_space<vmem>>, vector<16x256xf32>,
    %c0_221 = arith.constant 0 : index
    %c129_222 = arith.constant 129 : index
    %284 = vector.load %arg9[%c0_221, %c129_222] : memref<16x512xf32, #tpu.memory_space<vmem>>, vector<16x256xf32>
    %285 = arith.maximumf %282, %284 : vector<16x256xf32>
    %c0_223 = arith.constant 0 : index
    %c128_224 = arith.constant 128 : index
    %286 = vector.load %arg9[%c0_223, %c128_224] : memref<16x512xf32, #tpu.memory_space<vmem>>, vector<16x256xf32>
    tpu.vector_store %arg9[%c0_223, %c128_224], %285 {strides = array<i32>} : memref<16x512xf32, #tpu.memory_space<vmem>>, vector<16x256xf32>,
    %c0_225 = arith.constant 0 : index
    %c144_226 = arith.constant 144 : index
    %287 = vector.load %arg9[%c0_225, %c144_226] : memref<16x512xf32, #tpu.memory_space<vmem>>, vector<16x256xf32>
    %288 = arith.maximumf %285, %287 : vector<16x256xf32>
    %289 = arith.truncf %288 : vector<16x256xf32> to vector<16x256xbf16>
    %c0_227 = arith.constant 0 : index
    %c0_228 = arith.constant 0 : index
    %290 = vector.load %arg4[%c0_227, %c0_228] : memref<256x160xbf16, #tpu.memory_space<vmem>>, vector<256x160xbf16>
    %cst_229 = arith.constant dense<0.000000e+00> : vector<16x160xf32>
    %291 = tpu.matmul %289, %290, %cst_229 {dimension_numbers = #tpu.dot_dimension_numbers<[1], [0], [0], [1], [0, 0, 1, 1], [], []>} : vector<16x256xbf16>, vector<256x160xbf16>, vector<16x160xf32> -> vector<16x160xf32>
    %c0_230 = arith.constant 0 : index
    %c0_231 = arith.constant 0 : index
    %292 = vector.load %arg5[%c0_230, %c0_231] : memref<16x160xf32, #tpu.memory_space<vmem>>, vector<16x160xf32>
    %293 = arith.mulf %291, %292 : vector<16x160xf32>
    %c0_232 = arith.constant 0 : index
    %c0_233 = arith.constant 0 : index
    %294 = vector.load %arg6[%c0_232, %c0_233] : memref<160x10xf32, #tpu.memory_space<vmem>>, vector<160x10xf32>
    %cst_234 = arith.constant dense<0.000000e+00> : vector<16x10xf32>
    %295 = tpu.matmul %293, %294, %cst_234 {dimension_numbers = #tpu.dot_dimension_numbers<[1], [0], [0], [1], [0, 0, 1, 1], [], []>} : vector<16x160xf32>, vector<160x10xf32>, vector<16x10xf32> -> vector<16x10xf32>
    %cst_235 = arith.constant dense<0.000000e+00> : vector<10xf32>
    %296 = vector.multi_reduction <add>, %295, %cst_235 [0] : vector<16x10xf32> to vector<10xf32>
    %297 = vector.shape_cast %296 : vector<10xf32> to vector<1x10xf32>
    %c0_236 = arith.constant 0 : index
    %c0_237 = arith.constant 0 : index
    %298 = vector.load %arg7[%c0_236, %c0_237] : memref<1x10xf32, #tpu.memory_space<vmem>>, vector<1x10xf32>
    %299 = arith.addf %297, %298 : vector<1x10xf32>
    %c0_238 = arith.constant 0 : index
    %c0_239 = arith.constant 0 : index
    %c0_240 = arith.constant 0 : index
    %300 = vector.load %arg8[%c0_238, %c0_239, %c0_240] : memref<1x1x10xf32, #tpu.memory_space<vmem>>, vector<1x1x10xf32>
    %301 = vector.shape_cast %300 : vector<1x1x10xf32> to vector<1x10xf32>
    %302 = vector.shape_cast %299 : vector<1x10xf32> to vector<1x1x10xf32>
    tpu.vector_store %arg8[%c0_238, %c0_239, %c0_240], %302 {strides = array<i32>} : memref<1x1x10xf32, #tpu.memory_space<vmem>>, vector<1x1x10xf32>,
    return
  }
  func.func @transform_0(%arg0: i32) -> (i32, i32, i32) {
    %c0_i32 = arith.constant 0 : i32
    %c0_i32_0 = arith.constant 0 : i32
    %c0_i32_1 = arith.constant 0 : i32
    return %arg0, %c0_i32, %c0_i32_0 : i32, i32, i32
  }
  func.func @transform_1(%arg0: i32) -> (i32, i32, i32, i32) {
    %c0_i32 = arith.constant 0 : i32
    %c0_i32_0 = arith.constant 0 : i32
    %c0_i32_1 = arith.constant 0 : i32
    %c0_i32_2 = arith.constant 0 : i32
    %c0_i32_3 = arith.constant 0 : i32
    return %c0_i32, %c0_i32_0, %c0_i32_1, %c0_i32_2 : i32, i32, i32, i32
  }
  func.func @transform_2(%arg0: i32) -> (i32, i32, i32) {
    %c0_i32 = arith.constant 0 : i32
    %c0_i32_0 = arith.constant 0 : i32
    %c0_i32_1 = arith.constant 0 : i32
    %c0_i32_2 = arith.constant 0 : i32
    return %c0_i32, %c0_i32_0, %c0_i32_1 : i32, i32, i32
  }
  func.func @transform_3(%arg0: i32) -> (i32, i32) {
    %c0_i32 = arith.constant 0 : i32
    %c0_i32_0 = arith.constant 0 : i32
    %c0_i32_1 = arith.constant 0 : i32
    return %c0_i32, %c0_i32_0 : i32, i32
  }
  func.func @transform_4(%arg0: i32) -> (i32, i32) {
    %c0_i32 = arith.constant 0 : i32
    %c0_i32_0 = arith.constant 0 : i32
    %c0_i32_1 = arith.constant 0 : i32
    return %c0_i32, %c0_i32_0 : i32, i32
  }
  func.func @transform_5(%arg0: i32) -> (i32, i32) {
    %c0_i32 = arith.constant 0 : i32
    %c0_i32_0 = arith.constant 0 : i32
    %c0_i32_1 = arith.constant 0 : i32
    return %c0_i32, %c0_i32_0 : i32, i32
  }
  func.func @transform_6(%arg0: i32) -> (i32, i32) {
    %c0_i32 = arith.constant 0 : i32
    %c0_i32_0 = arith.constant 0 : i32
    %c0_i32_1 = arith.constant 0 : i32
    return %c0_i32, %c0_i32_0 : i32, i32
  }
  func.func @transform_7(%arg0: i32) -> (i32, i32, i32) {
    %c0_i32 = arith.constant 0 : i32
    %c0_i32_0 = arith.constant 0 : i32
    %c0_i32_1 = arith.constant 0 : i32
    return %arg0, %c0_i32, %c0_i32_0 : i32, i32, i32
  }
}

</mosaic_0001>

<bundles_post_ra>
// kernel: cnn_forward_fused.1
= control target key start
LH: loop header
LB: loop body
LE: loop exit
PB: predicated region body
PF: predicated region fallthrough
CT: control target
= control target key end

     0   :  { %12 = vsyncpa [#allocation4], 0  ;;  %s4809_s0 = inlined_call_operand.vmem [shape: f32[2,16,256], index: 0, kind: input, shape index: {}]   ;;  %s4810_s1 = inlined_call_operand.vmem [shape: bf16[3,9,16,16], index: 1, kind: input, shape index: {}]   ;;  %s4811_s2 = inlined_call_operand.vmem [shape: f32[3,16,1], index: 2, kind: input, shape index: {}]   ;;  %s4812_s3 = inlined_call_operand.vmem [shape: bf16[256,160], index: 3, kind: input, shape index: {}]   ;;  %s4813_s4 = inlined_call_operand.vmem [shape: f32[16,160], index: 4, kind: input, shape index: {}]   ;;  %s4814_s5 = inlined_call_operand.vmem [shape: f32[160,10], index: 5, kind: input, shape index: {}]   ;;  %s4815_s6 = inlined_call_operand.vmem [shape: f32[1,10], index: 6, kind: input, shape index: {}]   ;;  %s4816_s7 = inlined_call_operand.hbm [shape: f32[2,1,10], index: 7, kind: output, shape index: {}]  }
   0x1   :  { %14 = vsyncpa [#allocation4 + $0x1], 0  ;;  %s4029_s24 = smov 0   ;;  %s4031_s25 = smov 0  }
   0x2   :  { %s4033_s26 = smov 0   ;;  %s4035_s27 = smov 0  }
   0x3 LB: > { %s4050_s28 = sadd.s32 4294967295, %s3975_s27   ;;  %s3098_s29 = sadd.s32 4294967294, %s3975_s27   ;;  %s3975_s27 = sphi %s4035_s27, %s4830_s27   ;;  %s3971_s26 = sphi %s4033_s26, %s4829_s26   ;;  %s3967_s25 = sphi %s4031_s25, %s4828_s25   ;;  %s3963_s24 = sphi %s4029_s24, %s4827_s24  }
   0x4   : > { %s4054_s30 = sadd.s32 1, %s3975_s27   ;;  %s179_s8 = sadd.s32 1, %s3971_s26 }
   0x5   : > { %s176_s9 = ssub.s32 %s3975_s27, %s4054_s30  ;;  %p189_p0 = scmp.ne.s32.totalorder %s3971_s26, %s3967_s25 }
   0x6   : > { %p177_p1 = scmp.eq.s32.totalorder %s176_s9, 0  ;;  %p190_p2 = scmp.eq.s32.totalorder %s4050_s28, 1 }
   0x7   : > { %p195_p3 = scmp.ne.s32.totalorder %s3967_s25, %s3963_s24  ;;  %p196_p4 = scmp.eq.s32.totalorder %s3098_s29, 1 }
   0x8   : > { %s4065_s10 = scalar_select %p177_p1, %s3971_s26, %s179_s8  }
   0x9   : > { %p4067_p5 = por %p190_p2, %p189_p0  ;;  %p4071_p6 = por %p196_p4, %p195_p3 }
   0xa   : > { %p3101_p7 = scmp.ge.s32.totalorder %s3975_s27, 1  ;;  %p240_p8 = scmp.lt.s32.totalorder %s3975_s27, 3 }
   0xc   : > { %p241_p9 = pnand %p3101_p7, %p240_p8 }
   0xd   : > { %p271_p10 = scmp.lt.s32.totalorder (!%p241_p9), %s4050_s28, 1  ;;  %v3977_v0 = vmov (!%p241_p9), 0.0|0.0   ;;  %s3978_s13 = smov (!%p241_p9), 16   ;;  %v3979_v1 = vmov (!%p241_p9), 0   ;;  %v3981_v9 = vmov (!%p241_p9), 0.0   ;;  %v1066_v14 = vld [vmem:[%s4811_s2] sm:$0xff] (!%p241_p9)  ;;  %v285_v16 = vlaneseq (!%p241_p9) }
   0xe   : > { %244 = sbr.rel (%p241_p9) target bundleno = 2037 (0x7f5), region = 48  ;;  %383 = vrot.lane.b32.xlu1 (!%p241_p9), %v3977_v0, %s3978_s13  ;;  %430 = vmatprep.mubr.bf16.mxu0 (!%p241_p9), %v3979_v1  ;;  %s3980_s19 = smov (!%p241_p9), 17   ;;  %v1067_v15 = vld [vmem:[%s4811_s2 + $0x8] sm:$0xff] (!%p241_p9)  ;;  %vm389_vm0 = vcmask (!%p241_p9), 130048   ;;  %vm352_vm1 = vcmask (!%p241_p9), 138240   ;;  %vm508_vm4 = vcmask (!%p241_p9), 121856  }
   0xf   : > { %3626 = vset.pattern.permute.xlu0 (!%p241_p9), %v3979_v1  ;;  %3627 = vset.pattern.permute.xlu1 (!%p241_p9), %v3979_v1  ;;  %s3982_s20 = smov (!%p241_p9), 15   ;;  %s3983_s21 = smov (!%p241_p9), 1   ;;  %v286_v18 = vand.u32 (!%p241_p9), 127, %v285_v16  ;;  %v3838_v31 = vld [vmem:[%s4810_s1 + $0x8] sm:$0xff] (!%p241_p9)   ;;  %v3839_v60 = vld [vmem:[%s4810_s1] sm:$0xff] (!%p241_p9)   ;;  %vm593_vm10 = vcmask (!%p241_p9), 7168  }
  0x10   : > { %1321 = vmatprep.mubr.bf16.mxu1 (!%p241_p9), %v3979_v1  ;;  %s3984_s22 = smov (!%p241_p9), 127   ;;  %s3985_s23 = smov (!%p241_p9), 113   ;;  %vm748_vm12 = vcmask (!%p241_p9), 1039360   ;;  %vm833_vm13 = vcmask (!%p241_p9), 924672   ;;  %vm926_vm14 = vcmask (!%p241_p9), 916480   ;;  %vm993_vm15 = vcmask (!%p241_p9), 908288  }
  0x11   : > { %s3986_s29 = smov (!%p241_p9), 112   ;;  %s3987_s8 = smov (!%p241_p9), 111   ;;  %v287_v21 = vadd.s32 (!%p241_p9), 128, %v286_v18  ;;  %v292_v27 = vand.u32 (!%p241_p9), 15, %v286_v18  ;;  %v3864_v52 = vld [vmem:[%s4810_s1 + $0xd0] sm:$0xff] (!%p241_p9)  }
  0x13   : > { %v299_v26 = vand.u32 (!%p241_p9), 15, %v287_v21  ;;  %vm312_vm3 = vcmp.ne.s32.totalorder (!%p241_p9), %v292_v27, 0  ;;  %vm314_vm9 = vcmp.ne.s32.totalorder (!%p241_p9), %v292_v27, 15  ;;  %v3841_v27 = vld [vmem:[%s4810_s1 + $0x18] sm:$0xff] (!%p241_p9)  }
  0x14   : > { %vm4146_vm6 = vmpackc.low (!%p241_p9), %vm312_vm3, %vm312_vm3 }
  0x15   : > { %s272_s14 = scalar_select %p271_p10, %s4050_s28, 1  ;;  %vm313_vm2 = vcmp.ne.s32.totalorder %v299_v26, 0  ;;  %vm315_vm7 = vcmp.ne.s32.totalorder %v299_v26, 15  ;;  %vm4167_vm11 = vmpackc.low %vm314_vm9, %vm314_vm9 }
  0x16   : > { %vm4141_vm5 = vmpackc.low %vm313_vm2, %vm313_vm2  ;;  %vm3028_vm2 = vcmask 73728  }
  0x17   : > { %s3359_s15 = sshll.u32 %s272_s14, 5  ;;  %vm4156_vm8 = vmpackc.low %vm315_vm7, %vm315_vm7 }
  0x18   : > { %s275_s18 = scalar_lea.vmem %s4809_s0, %s3359_s15 }
  0x19   : > { %v316_v2 = vld [vmem:[%s275_s18] sm:$0xff]  ;;  %v318_v3 = vld [vmem:[%s275_s18 + $0x10] sm:$0xff]  ;;  %v317_v4 = vld [vmem:[%s275_s18 + $0x8] sm:$0xff] }
  0x1a   : > { %v4088_v5 = vpack.c.bf16 %v318_v3, %v316_v2  ;;  %v3536_v6 = vpack.i.bf16 %v317_v4, %v316_v2  ;;  %v319_v7 = vld [vmem:[%s275_s18 + $0x18] sm:$0xff]  ;;  %v3581_v12 = vpack.i.bf16 %v3981_v9, %v317_v4  ;;  %v3591_v13 = vpack.i.bf16 %v318_v3, %v316_v2 }
  0x1b   : > { %v4093_v8 = vpack.c.bf16 %v319_v7, %v317_v4  ;;  %v3541_v10 = vpack.i.bf16 %v319_v7, %v318_v3  ;;  %v3586_v11 = vpack.i.bf16 %v3981_v9, %v319_v7 }
  0x1c   : > { %385 = vrot.lane.b32.xlu0 %v4088_v5, %s3978_s13  ;;  %3537 = vrot.lane.b32.xlu1 %v3536_v6, %s3980_s19 }
  0x20   : > { %387 = vrot.lane.b32.xlu0 %v4093_v8, %s3978_s13  ;;  %3547 = vrot.lane.b32.xlu1 %v3981_v9, %s3980_s19 }
  0x24   : > { %3542 = vrot.lane.b32.xlu0 %v3541_v10, %s3980_s19  ;;  %3557 = vrot.lane.b32.xlu1 %v3541_v10, %s3982_s20 }
  0x28   : > { %3552 = vrot.lane.b32.xlu0 %v3536_v6, %s3982_s20  ;;  %3567 = vrot.lane.b32.xlu1 %v3536_v6, %s3983_s21 }
  0x2c   : > { %3562 = vrot.lane.b32.xlu0 %v3981_v9, %s3982_s20  ;;  %3577 = vrot.lane.b32.xlu1 %v3981_v9, %s3983_s21 }
  0x30   : > { %3572 = vrot.lane.b32.xlu0 %v3541_v10, %s3983_s21  ;;  %3587 = vrot.lane.b32.xlu1 %v3586_v11, %s3984_s22 }
  0x34   : > { %3582 = vrot.lane.b32.xlu0 %v3581_v12, %s3984_s22  ;;  %3597 = vrot.lane.b32.xlu1 %v3581_v12, %s3985_s23 }
  0x38   : > { %3592 = vrot.lane.b32.xlu0 %v3591_v13, %s3984_s22  ;;  %3607 = vrot.lane.b32.xlu1 %v3591_v13, %s3985_s23 }
  0x3c   : > { %3602 = vrot.lane.b32.xlu0 %v3586_v11, %s3985_s23  ;;  %924 = vrot.lane.b32.xlu1 %v3977_v0, %s3986_s29 }
  0x40   : > { %922 = vrot.lane.b32.xlu0 %v4093_v8, %s3986_s29  ;;  %3612 = vrot.lane.b32.xlu1 %v3581_v12, %s3987_s8 }
  0x44   : > { %920 = vrot.lane.b32.xlu0 %v4088_v5, %s3986_s29  ;;  %3622 = vrot.lane.b32.xlu1 %v3591_v13, %s3987_s8 }
  0x48   : > { %3617 = vrot.lane.b32.xlu0 %v3586_v11, %s3987_s8  ;;  %1075 = vperm.xlu1 %3627, %v1067_v15  }
  0x4c   : > { %1070 = vperm.xlu0 %3626, %v1066_v14  }
  0x80   : > { %v384_v17 = vpop.permute.xlu1 %383 }
  0x8e   : > { %v386_v19 = vpop.permute.xlu0 %385  ;;  %v3538_v20 = vpop.permute.xlu1 %3537 }
  0x8f   : > { %v3540_v22 = vunpack.i.h.bf16 %v3538_v20  ;;  %v3539_v23 = vunpack.i.l.bf16 %v3538_v20  ;;  %v390_v30 = vsel %vm389_vm0, %v384_v17, %v386_v19  ;;  %v3840_v17 = vld [vmem:[%s4810_s1 + $0x10] sm:$0xff]  }
  0x91   : > { %v354_v33 = vsel %vm352_vm1, %v3539_v23, %v3540_v22 }
  0x92   : > { %v388_v24 = vpop.permute.xlu0 %387  ;;  %v3548_v25 = vpop.permute.xlu1 %3547 }
  0x93   : > { %v3549_v28 = vunpack.i.l.bf16 %v3548_v25  ;;  %v391_v29 = vsel %vm389_vm0, %v386_v19, %v388_v24  ;;  %v3550_v32 = vunpack.i.h.bf16 %v3548_v25 }
  0x94   : > { %398 = vmatprep.subr.bf16.mxu0 %v391_v29 }
  0x95   : > { %399 = vmatpush1.bf16.msra.mxu0 %v390_v30  ;;  %v353_v34 = vsel %vm352_vm1, %v3549_v28, %v3539_v23 }
  0x96   : > { %v3543_v35 = vpop.permute.xlu0 %3542  ;;  %v3558_v36 = vpop.permute.xlu1 %3557 }
  0x97   : > { %v3545_v37 = vunpack.i.h.bf16 %v3543_v35  ;;  %v3544_v38 = vunpack.i.l.bf16 %v3543_v35  ;;  %v3560_v39 = vunpack.i.h.bf16 %v3558_v36  ;;  %v3559_v40 = vunpack.i.l.bf16 %v3558_v36 }
  0x98   : > { %3107 = vmatmul.mubr.msk.bf16.vlgmr.msra.gmra.mrb[0].mxu0 %vm389_vm0, %v3838_v31 }
  0x99   : > { %v355_v41 = vsel %vm352_vm1, %v3550_v32, %v3544_v38  ;;  %v356_v42 = vsel %vm352_vm1, %v3544_v38, %v3545_v37  ;;  %481 = vmatprep.mubr.bf16.mxu0 %v3979_v1  ;;  %v512_v50 = vsel %vm508_vm4, %v3559_v40, %v3560_v39 }
  0x9a   : > { %v3110_v44 = vpack.c.bf16 %v356_v42, %v354_v33  ;;  %v3113_v45 = vpack.c.bf16 %v355_v41, %v353_v34  ;;  %v3553_v46 = vpop.permute.xlu0 %3552  ;;  %v3568_v53 = vpop.permute.xlu1 %3567 }
  0x9b   : > { %v3555_v48 = vunpack.i.h.bf16 %v3553_v46  ;;  %v3554_v49 = vunpack.i.l.bf16 %v3553_v46  ;;  %v3570_v58 = vunpack.i.h.bf16 %v3568_v53  ;;  %v3569_v59 = vunpack.i.l.bf16 %v3568_v53 }
  0x9c   : > { %3111 = vmatprep.subr.msk.bf16.mxu0 %vm4141_vm5, %v3110_v44 }
  0x9d   : > { %v510_v51 = vsel %vm508_vm4, %v3554_v49, %v3555_v48  ;;  %3114 = vmatpush1.bf16.msk.msra.mxu0 %vm4146_vm6, %v3113_v45  ;;  %v595_v4 = vsel %vm593_vm10, %v3569_v59, %v3570_v58 }
  0x9e   : > { %v3120_v54 = vpack.c.bf16 %v512_v50, %v510_v51  ;;  %v3563_v55 = vpop.permute.xlu0 %3562  ;;  %v3578_v10 = vpop.permute.xlu1 %3577  ;;  %v3843_v51 = vld [vmem:[%s4810_s1 + $0x28] sm:$0xff]  }
  0x9f   : > { %v3565_v56 = vunpack.i.h.bf16 %v3563_v55  ;;  %v3564_v57 = vunpack.i.l.bf16 %v3563_v55  ;;  %v3580_v13 = vunpack.i.h.bf16 %v3578_v10  ;;  %v3579_v14 = vunpack.i.l.bf16 %v3578_v10 }
  0xa0   : > { %3121 = vmatprep.subr.msk.bf16.mxu0 %vm4156_vm8, %v3120_v54 }
  0xa1   : > { %v511_v61 = vsel %vm508_vm4, %v3565_v56, %v3559_v40  ;;  %v509_v62 = vsel %vm508_vm4, %v3564_v57, %v3554_v49  ;;  %v594_v15 = vsel %vm593_vm10, %v3579_v14, %v3569_v59  ;;  %v3842_v40 = vld [vmem:[%s4810_s1 + $0x20] sm:$0xff]  }
  0xa2   : > { %v3123_v63 = vpack.c.bf16 %v511_v61, %v509_v62  ;;  %v3573_v3 = vpop.permute.xlu0 %3572  ;;  %v3588_v19 = vpop.permute.xlu1 %3587 }
  0xa3   : > { %v3575_v6 = vunpack.i.h.bf16 %v3573_v3  ;;  %v3574_v7 = vunpack.i.l.bf16 %v3573_v3  ;;  %v3590_v23 = vunpack.i.h.bf16 %v3588_v19  ;;  %v3589_v24 = vunpack.i.l.bf16 %v3588_v19 }
  0xa4   : > { %3115 = vmatmul.mubr.msk.bf16.vlgmr.msra.gmra.mrb[0].mxu0 %vm389_vm0, %v3839_v60 }
  0xa5   : > { %3124 = vmatpush1.bf16.msk.msra.mxu0 %vm4167_vm11, %v3123_v63  ;;  %v597_v11 = vsel %vm593_vm10, %v3574_v7, %v3575_v6  ;;  %566 = vmatprep.mubr.bf16.mxu0 %v3979_v1  ;;  %v596_v16 = vsel %vm593_vm10, %v3580_v13, %v3574_v7  ;;  %v752_v26 = vsel %vm748_vm12, %v3589_v24, %v3590_v23 }
  0xa6   : > { %v3130_v12 = vpack.c.bf16 %v597_v11, %v595_v4  ;;  %v3133_v18 = vpack.c.bf16 %v596_v16, %v594_v15  ;;  %v3583_v20 = vpop.permute.xlu0 %3582  ;;  %v3598_v32 = vpop.permute.xlu1 %3597  ;;  %v3844_v4 = vld [vmem:[%s4810_s1 + $0x30] sm:$0xff]   ;;  %v3845_v15 = vld [vmem:[%s4810_s1 + $0x38] sm:$0xff]  }
  0xa7   : > { %v3585_v21 = vunpack.i.h.bf16 %v3583_v20  ;;  %v3584_v22 = vunpack.i.l.bf16 %v3583_v20  ;;  %v3600_v33 = vunpack.i.h.bf16 %v3598_v32  ;;  %v3599_v34 = vunpack.i.l.bf16 %v3598_v32 }
  0xa8   : > { %3131 = vmatprep.subr.msk.bf16.mxu0 %vm4141_vm5, %v3130_v12 }
  0xa9   : > { %v750_v25 = vsel %vm748_vm12, %v3584_v22, %v3585_v21  ;;  %v835_v39 = vsel %vm833_vm13, %v3599_v34, %v3600_v33 }
  0xaa   : > { %v3593_v28 = vpop.permute.xlu0 %3592  ;;  %v3144_v29 = vpack.c.bf16 %v752_v26, %v750_v25  ;;  %v3608_v44 = vpop.permute.xlu1 %3607 }
  0xab   : > { %v3594_v31 = vunpack.i.l.bf16 %v3593_v28  ;;  %v3610_v45 = vunpack.i.h.bf16 %v3608_v44  ;;  %v3609_v46 = vunpack.i.l.bf16 %v3608_v44 }
  0xad   : > { %v749_v38 = vsel %vm748_vm12, %v3594_v31, %v3584_v22  ;;  %v834_v49 = vsel %vm833_vm13, %v3609_v46, %v3599_v34 }
  0xae   : > { %v3603_v30 = vpop.permute.xlu0 %3602  ;;  %v925_v53 = vpop.permute.xlu1 %924 }
  0xaf   : > { %v3605_v35 = vunpack.i.h.bf16 %v3603_v30  ;;  %v3604_v36 = vunpack.i.l.bf16 %v3603_v30 }
  0xb0   : > { %3125 = vmatmul.mubr.msk.bf16.vlgmr.msra.gmra.mrb[0].mxu0 %vm389_vm0, %v3840_v17  ;;  %v3846_v17 = vld [vmem:[%s4810_s1 + $0x40] sm:$0xff]  }
  0xb1   : > { %3134 = vmatpush1.bf16.msk.msra.mxu0 %vm4146_vm6, %v3133_v18  ;;  %651 = vmatprep.mubr.bf16.mxu0 %v3979_v1  ;;  %v836_v50 = vsel %vm833_vm13, %v3610_v45, %v3604_v36 }
  0xb2   : > { %677 = vmatprep.subr.bf16.mxu0 %v4093_v8  ;;  %v3595_v8 = vunpack.i.h.bf16 %v3593_v28  ;;  %v923_v48 = vpop.permute.xlu0 %922  ;;  %v3157_v55 = vpack.c.bf16 %v836_v50, %v834_v49  ;;  %v3613_v58 = vpop.permute.xlu1 %3612 }
  0xb3   : > { %v928_v56 = vsel %vm926_vm14, %v923_v48, %v925_v53  ;;  %v3615_v59 = vunpack.i.h.bf16 %v3613_v58  ;;  %v3614_v60 = vunpack.i.l.bf16 %v3613_v58 }
  0xb4   : > { %v751_v37 = vsel %vm748_vm12, %v3595_v8, %v3589_v24 }
  0xb5   : > { %v3147_v41 = vpack.c.bf16 %v751_v37, %v749_v38  ;;  %v995_v63 = vsel %vm993_vm15, %v3614_v60, %v3615_v59  ;;  %v3246_v38 = vld [vmem:[%s4811_s2 + $0x10] sm:$0xff] }
  0xb6   : > { %v921_v54 = vpop.permute.xlu0 %920  ;;  %v3623_v10 = vpop.permute.xlu1 %3622 }
  0xb7   : > { %v927_v6 = vsel %vm926_vm14, %v921_v54, %v923_v48  ;;  %v3625_v11 = vunpack.i.h.bf16 %v3623_v10  ;;  %v3624_v12 = vunpack.i.l.bf16 %v3623_v10 }
  0xb9   : > { %v994_v13 = vsel %vm993_vm15, %v3624_v12, %v3614_v60 }
  0xba   : > { %v3618_v57 = vpop.permute.xlu0 %3617 }
  0xbb   : > { %v3620_v61 = vunpack.i.h.bf16 %v3618_v57  ;;  %v3619_v62 = vunpack.i.l.bf16 %v3618_v57 }
  0xbc   : > { %3135 = vmatmul.mubr.msk.bf16.vlgmr.msra.gmra.mrb[0].mxu0 %vm389_vm0, %v3841_v27 }
  0xbd   : > { %678 = vmatpush1.bf16.msra.mxu0 %v4088_v5  ;;  %709 = vmatprep.mubr.bf16.mxu0 %v3979_v1  ;;  %v837_v5 = vsel %vm833_vm13, %v3604_v36, %v3605_v35  ;;  %v997_v3 = vsel %vm993_vm15, %v3619_v62, %v3620_v61  ;;  %v996_v14 = vsel %vm993_vm15, %v3625_v11, %v3619_v62 }
  0xbe   : > { %3145 = vmatprep.subr.msk.bf16.mxu0 %vm4156_vm8, %v3144_v29  ;;  %v3154_v42 = vpack.c.bf16 %v837_v5, %v835_v39  ;;  %v3168_v7 = vpack.c.bf16 %v997_v3, %v995_v63  ;;  %v3171_v16 = vpack.c.bf16 %v996_v14, %v994_v13  ;;  %v3247_v39 = vld [vmem:[%s4811_s2 + $0x18] sm:$0xff] }
  0xbf   : > { %v3847_v63 = vld [vmem:[%s4810_s1 + $0x58] sm:$0xff]  }
  0xc7   : > { %v1076_v20 = vpop.permute.xlu1 %1075 }
  0xc8   : > { %3139 = vmatmul.mubr.msk.bf16.vlgmr.msra.gmra.mrb[0].mxu0 %vm389_vm0, %v3842_v40 }
  0xc9   : > { %3148 = vmatpush1.bf16.msk.msra.mxu0 %vm4167_vm11, %v3147_v41  ;;  %806 = vmatprep.mubr.bf16.mxu0 %v3979_v1 }
  0xca   : > { %3155 = vmatprep.subr.msk.bf16.mxu0 %vm4141_vm5, %v3154_v42 }
  0xcb   : > { %v1071_v18 = vpop.permute.xlu0 %1070 }
  0xd4   : > { %3149 = vmatmul.mubr.msk.bf16.vlgmr.msra.gmra.mrb[0].mxu0 %vm389_vm0, %v3843_v51 }
  0xd5   : > { %3158 = vmatpush1.bf16.msk.msra.mxu0 %vm4146_vm6, %v3157_v55  ;;  %891 = vmatprep.mubr.bf16.mxu0 %v3979_v1 }
  0xd6   : > { %934 = vmatprep.subr.bf16.mxu0 %v928_v56 }
  0xe0   : > { %3159 = vmatmul.mubr.msk.bf16.vlgmr.msra.gmra.mrb[0].mxu0 %vm389_vm0, %v3844_v4 }
  0xe1   : > { %935 = vmatpush1.bf16.msra.mxu0 %v927_v6  ;;  %966 = vmatprep.mubr.bf16.mxu0 %v3979_v1 }
  0xe2   : > { %3169 = vmatprep.subr.msk.bf16.mxu0 %vm4156_vm8, %v3168_v7 }
  0xec   : > { %3163 = vmatmul.mubr.msk.bf16.vlgmr.msra.gmra.mrb[0].mxu0 %vm389_vm0, %v3845_v15 }
  0xed   : > { %3172 = vmatpush1.bf16.msk.msra.mxu0 %vm4167_vm11, %v3171_v16  ;;  %1051 = vmatprep.mubr.bf16.mxu0 %v3979_v1 }
  0xf8   : > { %3173 = vmatmul.mubr.msk.bf16.vlgmr.msra.gmra.mrb[0].mxu0 %vm389_vm0, %v3846_v17 }
  0xf9   : > { %1190 = vmatprep.mubr.bf16.mxu0 %v3979_v1 }
 0x1cb   : > { %v1053_v19 = vpop.f32.mrb[0].mxu0 }
 0x1cc   : > { %v1078_v21 = vadd.f32 %v1071_v18, %v1053_v19  ;;  %v1055_v22 = vpop.f32.mrb[1].mxu0 }
 0x1cd   : > { %v1079_v23 = vadd.f32 %v1071_v18, %v1055_v22  ;;  %v1057_v24 = vpop.f32.mrb[2].mxu0 }
 0x1ce   : > { %v1082_v25 = vmax.f32 %v1078_v21, 0.0  ;;  %v1080_v26 = vadd.f32 %v1076_v20, %v1057_v24  ;;  %v1059_v27 = vpop.f32.mrb[3].mxu0  ;;  %v3848_v24 = vld [vmem:[%s4810_s1 + $0x60] sm:$0xff]  }
 0x1cf   : > { %v1083_v28 = vmax.f32 %v1079_v23, 0.0  ;;  %v1081_v29 = vadd.f32 %v1076_v20, %v1059_v27 }
 0x1d0   : > { %v1084_v30 = vmax.f32 %v1080_v26, 0.0 }
 0x1d1   : > { %v1085_v8 = vmax.f32 %v1081_v29, 0.0  ;;  %v3628_v31 = vpack.i.bf16 %v1083_v28, %v1082_v25  ;;  %v3658_v36 = vpack.i.bf16 %v3981_v9, %v1083_v28 }
 0x1d2   : > { %v3668_v32 = vpack.i.bf16 %v1084_v30, %v1082_v25  ;;  %v4246_v33 = vpack.c.bf16 %v1084_v30, %v1082_v25 }
 0x1d3   : > { %3629 = vrot.lane.b32.xlu1 %v3628_v31, %s3982_s20  ;;  %v3633_v34 = vpack.i.bf16 %v1085_v8, %v1084_v30  ;;  %v4249_v35 = vpack.c.bf16 %v1085_v8, %v1083_v28  ;;  %v3663_v37 = vpack.i.bf16 %v3981_v9, %v1085_v8 }
 0x1d5   : > { %3634 = vrot.lane.b32.xlu0 %v3633_v34, %s3982_s20 }
 0x1d7   : > { %3639 = vrot.lane.b32.xlu1 %v3981_v9, %s3982_s20 }
 0x1d9   : > { %3644 = vrot.lane.b32.xlu0 %v3628_v31, %s3983_s21 }
 0x1db   : > { %3649 = vrot.lane.b32.xlu1 %v3633_v34, %s3983_s21 }
 0x1dd   : > { %3654 = vrot.lane.b32.xlu0 %v3981_v9, %s3983_s21 }
 0x1df   : > { %3659 = vrot.lane.b32.xlu1 %v3658_v36, %s3984_s22 }
 0x1e1   : > { %3664 = vrot.lane.b32.xlu0 %v3663_v37, %s3984_s22 }
 0x1e3   : > { %3669 = vrot.lane.b32.xlu1 %v3668_v32, %s3984_s22 }
 0x1e5   : > { %3674 = vrot.lane.b32.xlu0 %v3658_v36, %s3985_s23 }
 0x1e7   : > { %3679 = vrot.lane.b32.xlu1 %v3663_v37, %s3985_s23 }
 0x1e9   : > { %3684 = vrot.lane.b32.xlu0 %v3668_v32, %s3985_s23 }
 0x1eb   : > { %1145 = vrot.lane.b32.xlu1 %v3977_v0, %s3978_s13 }
 0x1ed   : > { %1676 = vrot.lane.b32.xlu0 %v3977_v0, %s3986_s29 }
 0x1ef   : > { %1147 = vrot.lane.b32.xlu1 %v4246_v33, %s3978_s13 }
 0x1f1   : > { %1672 = vrot.lane.b32.xlu0 %v4246_v33, %s3986_s29 }
 0x1f3   : > { %1674 = vrot.lane.b32.xlu1 %v4249_v35, %s3986_s29 }
 0x1f5   : > { %1149 = vrot.lane.b32.xlu0 %v4249_v35, %s3978_s13 }
 0x1f7   : > { %3689 = vrot.lane.b32.xlu1 %v3628_v31, %s3980_s19 }
 0x1f9   : > { %3694 = vrot.lane.b32.xlu0 %v3633_v34, %s3980_s19 }
 0x1fb   : > { %3699 = vrot.lane.b32.xlu1 %v3658_v36, %s3987_s8 }
 0x1fd   : > { %3704 = vrot.lane.b32.xlu0 %v3663_v37, %s3987_s8 }
 0x1ff   : > { %3709 = vrot.lane.b32.xlu1 %v3981_v9, %s3980_s19 }
 0x201   : > { %3714 = vrot.lane.b32.xlu0 %v3668_v32, %s3987_s8 }
 0x203   : > { %1821 = vperm.xlu1 %3627, %v3246_v38  }
 0x205   : > { %1826 = vperm.xlu0 %3626, %v3247_v39  }
 0x245   : > { %v3630_v5 = vpop.permute.xlu1 %3629 }
 0x246   : > { %v3632_v40 = vunpack.i.h.bf16 %v3630_v5  ;;  %v3631_v41 = vunpack.i.l.bf16 %v3630_v5 }
 0x247   : > { %v3635_v42 = vpop.permute.xlu0 %3634 }
 0x248   : > { %v3637_v44 = vunpack.i.h.bf16 %v3635_v42  ;;  %v3636_v45 = vunpack.i.l.bf16 %v3635_v42  ;;  %v1265_v50 = vsel %vm508_vm4, %v3631_v41, %v3632_v40  ;;  %v3849_v40 = vld [vmem:[%s4810_s1 + $0x68] sm:$0xff]  }
 0x249   : > { %v3640_v46 = vpop.permute.xlu1 %3639 }
 0x24a   : > { %v3642_v48 = vunpack.i.h.bf16 %v3640_v46  ;;  %v3641_v49 = vunpack.i.l.bf16 %v3640_v46  ;;  %v1267_v51 = vsel %vm508_vm4, %v3636_v45, %v3637_v44 }
 0x24b   : > { %v3645_v53 = vpop.permute.xlu0 %3644  ;;  %v3192_v54 = vpack.c.bf16 %v1267_v51, %v1265_v50  ;;  %v3851_v50 = vld [vmem:[%s4810_s1 + $0x50] sm:$0xff]  }
 0x24c   : > { %v3647_v55 = vunpack.i.h.bf16 %v3645_v53  ;;  %v3646_v56 = vunpack.i.l.bf16 %v3645_v53  ;;  %v1264_v57 = vsel %vm508_vm4, %v3641_v49, %v3631_v41  ;;  %v1266_v58 = vsel %vm508_vm4, %v3642_v48, %v3636_v45 }
 0x24d   : > { %v3650_v59 = vpop.permute.xlu1 %3649  ;;  %3193 = vmatprep.subr.msk.bf16.mxu1 %vm4156_vm8, %v3192_v54  ;;  %v3195_v60 = vpack.c.bf16 %v1266_v58, %v1264_v57 }
 0x24e   : > { %v3652_v61 = vunpack.i.h.bf16 %v3650_v59  ;;  %v3651_v62 = vunpack.i.l.bf16 %v3650_v59  ;;  %v1349_v4 = vsel %vm593_vm10, %v3646_v56, %v3647_v55 }
 0x24f   : > { %v3655_v3 = vpop.permute.xlu0 %3654  ;;  %3196 = vmatpush1.bf16.msk.msra.mxu1 %vm4167_vm11, %v3195_v60 }
 0x250   : > { %v1351_v6 = vsel %vm593_vm10, %v3651_v62, %v3652_v61  ;;  %v3657_v7 = vunpack.i.h.bf16 %v3655_v3  ;;  %v3656_v10 = vunpack.i.l.bf16 %v3655_v3 }
 0x251   : > { %v3202_v11 = vpack.c.bf16 %v1351_v6, %v1349_v4  ;;  %v3660_v12 = vpop.permute.xlu1 %3659 }
 0x252   : > { %v1350_v13 = vsel %vm593_vm10, %v3657_v7, %v3651_v62  ;;  %v1348_v14 = vsel %vm593_vm10, %v3656_v10, %v3646_v56  ;;  %3197 = vmatmul.mubr.msk.bf16.vlgmr.msra.gmra.mrb[0].mxu1 %vm389_vm0, %v3847_v63  ;;  %v3662_v21 = vunpack.i.h.bf16 %v3660_v12  ;;  %v3661_v22 = vunpack.i.l.bf16 %v3660_v12 }
 0x253   : > { %v3205_v15 = vpack.c.bf16 %v1350_v13, %v1348_v14  ;;  %v3665_v16 = vpop.permute.xlu0 %3664  ;;  %3203 = vmatprep.subr.msk.bf16.mxu1 %vm4141_vm5, %v3202_v11  ;;  %1405 = vmatprep.mubr.bf16.mxu1 %v3979_v1  ;;  %v3850_v11 = vld [vmem:[%s4810_s1 + $0x70] sm:$0xff]  }
 0x254   : > { %v3667_v18 = vunpack.i.h.bf16 %v3665_v16  ;;  %v3666_v19 = vunpack.i.l.bf16 %v3665_v16  ;;  %v1503_v27 = vsel %vm748_vm12, %v3661_v22, %v3662_v21  ;;  %v3853_v16 = vld [vmem:[%s4810_s1 + $0x48] sm:$0xff]  }
 0x255   : > { %v3670_v17 = vpop.permute.xlu1 %3669  ;;  %3206 = vmatpush1.bf16.msk.msra.mxu1 %vm4146_vm6, %v3205_v15 }
 0x256   : > { %1431 = vmatprep.subr.bf16.mxu1 %v4249_v35  ;;  %v1505_v25 = vsel %vm748_vm12, %v3666_v19, %v3667_v18  ;;  %v3672_v31 = vunpack.i.h.bf16 %v3670_v17  ;;  %v3671_v32 = vunpack.i.l.bf16 %v3670_v17 }
 0x257   : > { %v3675_v20 = vpop.permute.xlu0 %3674  ;;  %v3216_v29 = vpack.c.bf16 %v1505_v25, %v1503_v27 }
 0x258   : > { %v3677_v37 = vunpack.i.h.bf16 %v3675_v20  ;;  %v3676_v38 = vunpack.i.l.bf16 %v3675_v20  ;;  %v1502_v5 = vsel %vm748_vm12, %v3671_v32, %v3661_v22  ;;  %v3854_v32 = vld [vmem:[%s4810_s1 + $0x80] sm:$0xff]  }
 0x259   : > { %v3680_v23 = vpop.permute.xlu1 %3679 }
 0x25a   : > { %v3682_v34 = vunpack.i.h.bf16 %v3680_v23  ;;  %v3681_v35 = vunpack.i.l.bf16 %v3680_v23  ;;  %v1587_v46 = vsel %vm833_vm13, %v3676_v38, %v3677_v37  ;;  %v3852_v23 = vld [vmem:[%s4810_s1 + $0x78] sm:$0xff]  }
 0x25b   : > { %v3685_v26 = vpop.permute.xlu0 %3684 }
 0x25c   : > { %v1589_v41 = vsel %vm833_vm13, %v3681_v35, %v3682_v34  ;;  %v3687_v59 = vunpack.i.h.bf16 %v3685_v26  ;;  %v3686_v60 = vunpack.i.l.bf16 %v3685_v26 }
 0x25d   : > { %v1146_v28 = vpop.permute.xlu1 %1145  ;;  %v3226_v51 = vpack.c.bf16 %v1589_v41, %v1587_v46 }
 0x25e   : > { %3207 = vmatmul.mubr.msk.bf16.vlgmr.msra.gmra.mrb[0].mxu1 %vm389_vm0, %v3848_v24  ;;  %v1588_v4 = vsel %vm833_vm13, %v3687_v59, %v3681_v35  ;;  %v1586_v6 = vsel %vm833_vm13, %v3686_v60, %v3676_v38  ;;  %v3855_v35 = vld [vmem:[%s4810_s1 + $0x88] sm:$0xff]  }
 0x25f   : > { %1432 = vmatpush1.bf16.msra.mxu1 %v4246_v33  ;;  %v1677_v30 = vpop.permute.xlu0 %1676  ;;  %1463 = vmatprep.mubr.bf16.mxu1 %v3979_v1  ;;  %v1504_v33 = vsel %vm748_vm12, %v3672_v31, %v3666_v19  ;;  %v3229_v14 = vpack.c.bf16 %v1588_v4, %v1586_v6  ;;  %v3320_v6 = vld [vmem:[%s4811_s2 + $0x20] sm:$0xff] }
 0x260   : > { %3217 = vmatprep.subr.msk.bf16.mxu1 %vm4156_vm8, %v3216_v29  ;;  %v3219_v45 = vpack.c.bf16 %v1504_v33, %v1502_v5 }
 0x261   : > { %v1148_v8 = vpop.permute.xlu1 %1147 }
 0x262   : > { %v1151_v48 = vsel %vm389_vm0, %v1146_v28, %v1148_v8 }
 0x263   : > { %v4323_v36 = vpop.permute.xlu0 %1672 }
 0x265   : > { %v1675_v39 = vpop.permute.xlu1 %1674 }
 0x266   : > { %v1679_v17 = vsel %vm926_vm14, %v1675_v39, %v1677_v30  ;;  %v1678_v26 = vsel %vm926_vm14, %v4323_v36, %v1675_v39 }
 0x267   : > { %v1150_v42 = vpop.permute.xlu0 %1149 }
 0x268   : > { %v1152_v44 = vsel %vm389_vm0, %v1148_v8, %v1150_v42 }
 0x269   : > { %v3690_v49 = vpop.permute.xlu1 %3689  ;;  %1158 = vmatprep.subr.bf16.mxu0 %v1152_v44 }
 0x26a   : > { %v3692_v53 = vunpack.i.h.bf16 %v3690_v49  ;;  %v3691_v54 = vunpack.i.l.bf16 %v3690_v49  ;;  %1159 = vmatpush1.bf16.msra.mxu0 %v1151_v48  ;;  %3211 = vmatmul.mubr.msk.bf16.vlgmr.msra.gmra.mrb[0].mxu1 %vm389_vm0, %v3849_v40 }
 0x26b   : > { %3220 = vmatpush1.bf16.msk.msra.mxu1 %vm4167_vm11, %v3219_v45  ;;  %v3695_v55 = vpop.permute.xlu0 %3694  ;;  %1559 = vmatprep.mubr.bf16.mxu1 %v3979_v1 }
 0x26c   : > { %v3697_v56 = vunpack.i.h.bf16 %v3695_v55  ;;  %v3696_v57 = vunpack.i.l.bf16 %v3695_v55  ;;  %3227 = vmatprep.subr.msk.bf16.mxu1 %vm4141_vm5, %v3226_v51  ;;  %v1115_v61 = vsel %vm352_vm1, %v3691_v54, %v3692_v53 }
 0x26d   : > { %v3700_v58 = vpop.permute.xlu1 %3699  ;;  %3179 = vmatmul.mubr.msk.bf16.vlgmr.msra.gmra.mrb[4].mxu0 %vm389_vm0, %v3851_v50 }
 0x26e   : > { %v1117_v62 = vsel %vm352_vm1, %v3696_v57, %v3697_v56  ;;  %1241 = vmatprep.mubr.bf16.mxu0 %v3979_v1  ;;  %v3702_v21 = vunpack.i.h.bf16 %v3700_v58  ;;  %v3701_v22 = vunpack.i.l.bf16 %v3700_v58 }
 0x26f   : > { %v3182_v63 = vpack.c.bf16 %v1117_v62, %v1115_v61  ;;  %v3705_v18 = vpop.permute.xlu0 %3704 }
 0x270   : > { %v3707_v19 = vunpack.i.h.bf16 %v3705_v18  ;;  %v3706_v20 = vunpack.i.l.bf16 %v3705_v18  ;;  %v1745_v25 = vsel %vm993_vm15, %v3701_v22, %v3702_v21 }
 0x271   : > { %v3710_v3 = vpop.permute.xlu1 %3709  ;;  %3183 = vmatprep.subr.msk.bf16.mxu0 %vm4141_vm5, %v3182_v63 }
 0x272   : > { %v3712_v7 = vunpack.i.h.bf16 %v3710_v3  ;;  %v3711_v10 = vunpack.i.l.bf16 %v3710_v3  ;;  %v1747_v24 = vsel %vm993_vm15, %v3706_v20, %v3707_v19 }
 0x273   : > { %v3240_v27 = vpack.c.bf16 %v1747_v24, %v1745_v25  ;;  %v3715_v28 = vpop.permute.xlu0 %3714 }
 0x274   : > { %v1114_v12 = vsel %vm352_vm1, %v3711_v10, %v3691_v54  ;;  %v1116_v13 = vsel %vm352_vm1, %v3712_v7, %v3696_v57  ;;  %v3717_v29 = vunpack.i.h.bf16 %v3715_v28  ;;  %v3716_v30 = vunpack.i.l.bf16 %v3715_v28  ;;  %v3321_v7 = vld [vmem:[%s4811_s2 + $0x28] sm:$0xff] }
 0x275   : > { %v3185_v15 = vpack.c.bf16 %v1116_v13, %v1114_v12 }
 0x276   : > { %3221 = vmatmul.mubr.msk.bf16.vlgmr.msra.gmra.mrb[0].mxu1 %vm389_vm0, %v3850_v11  ;;  %v1744_v8 = vsel %vm993_vm15, %v3716_v30, %v3701_v22  ;;  %v1746_v31 = vsel %vm993_vm15, %v3717_v29, %v3706_v20 }
 0x277   : > { %3230 = vmatpush1.bf16.msk.msra.mxu1 %vm4146_vm6, %v3229_v14  ;;  %3186 = vmatpush1.bf16.msk.msra.mxu0 %vm4146_vm6, %v3185_v15  ;;  %v3243_v34 = vpack.c.bf16 %v1746_v31, %v1744_v8 }
 0x278   : > { %1685 = vmatprep.subr.bf16.mxu1 %v1679_v17  ;;  %1643 = vmatprep.mubr.bf16.mxu1 %v3979_v1 }
 0x27a   : > { %3187 = vmatmul.mubr.msk.bf16.vlgmr.msra.gmra.mrb[4].mxu0 %vm389_vm0, %v3853_v16  ;;  %v3856_v16 = vld [vmem:[%s4810_s1 + $0x98] sm:$0xff]  }
 0x27b   : > { %1941 = vmatprep.mubr.bf16.mxu0 %v3979_v1 }
 0x282   : > { %3231 = vmatmul.mubr.msk.bf16.vlgmr.msra.gmra.mrb[0].mxu1 %vm389_vm0, %v3852_v23  ;;  %v1822_v41 = vpop.permute.xlu1 %1821 }
 0x283   : > { %1686 = vmatpush1.bf16.msra.mxu1 %v1678_v26  ;;  %1717 = vmatprep.mubr.bf16.mxu1 %v3979_v1 }
 0x284   : > { %3241 = vmatprep.subr.msk.bf16.mxu1 %vm4156_vm8, %v3240_v27  ;;  %v1827_v49 = vpop.permute.xlu0 %1826 }
 0x28e   : > { %3235 = vmatmul.mubr.msk.bf16.vlgmr.msra.gmra.mrb[0].mxu1 %vm389_vm0, %v3854_v32 }
 0x28f   : > { %3244 = vmatpush1.bf16.msk.msra.mxu1 %vm4167_vm11, %v3243_v34  ;;  %1801 = vmatprep.mubr.bf16.mxu1 %v3979_v1 }
 0x29a   : > { %3245 = vmatmul.mubr.msk.bf16.vlgmr.msra.gmra.mrb[0].mxu1 %vm389_vm0, %v3855_v35 }
 0x34d   : > { %v1243_v36 = vpop.f32.mrb[4].mxu0 }
 0x34e   : > { %v1245_v37 = vpop.f32.mrb[5].mxu0 }
 0x34f   : > { %v1247_v38 = vpop.f32.mrb[6].mxu0 }
 0x350   : > { %v1249_v39 = vpop.f32.mrb[7].mxu0 }
 0x36d   : > { %v1803_v5 = vpop.f32.mrb[0].mxu1 }
 0x36e   : > { %v3390_v33 = vadd.f32 %v1803_v5, %v1243_v36  ;;  %v1805_v40 = vpop.f32.mrb[1].mxu1 }
 0x36f   : > { %v3391_v42 = vadd.f32 %v1805_v40, %v1245_v37  ;;  %v1807_v44 = vpop.f32.mrb[2].mxu1 }
 0x370   : > { %v1829_v45 = vadd.f32 %v3390_v33, %v1822_v41  ;;  %v3392_v46 = vadd.f32 %v1807_v44, %v1247_v38  ;;  %v1809_v48 = vpop.f32.mrb[3].mxu1 }
 0x371   : > { %v1830_v50 = vadd.f32 %v3391_v42, %v1822_v41  ;;  %v3393_v51 = vadd.f32 %v1809_v48, %v1249_v39  ;;  %v3857_v42 = vld [vmem:[%s4810_s1 + $0x90] sm:$0xff]  }
 0x372   : > { %v1833_v53 = vmax.f32 %v1829_v45, 0.0  ;;  %v1831_v54 = vadd.f32 %v3392_v46, %v1827_v49 }
 0x373   : > { %v1834_v55 = vmax.f32 %v1830_v50, 0.0  ;;  %v1832_v56 = vadd.f32 %v3393_v51, %v1827_v49 }
 0x374   : > { %v1835_v57 = vmax.f32 %v1831_v54, 0.0 }
 0x375   : > { %v1836_v58 = vmax.f32 %v1832_v56, 0.0  ;;  %v3718_v59 = vpack.i.bf16 %v1834_v55, %v1833_v53  ;;  %v3763_v3 = vpack.i.bf16 %v3981_v9, %v1834_v55 }
 0x376   : > { %v4392_v60 = vpack.c.bf16 %v1835_v57, %v1833_v53  ;;  %v3773_v61 = vpack.i.bf16 %v1835_v57, %v1833_v53 }
 0x377   : > { %v4394_v62 = vpack.c.bf16 %v1836_v58, %v1834_v55  ;;  %v3723_v63 = vpack.i.bf16 %v1836_v58, %v1835_v57  ;;  %v3768_v4 = vpack.i.bf16 %v3981_v9, %v1836_v58 }
 0x378   : > { %1898 = vrot.lane.b32.xlu1 %v4392_v60, %s3978_s13 }
 0x379   : > { %1900 = vrot.lane.b32.xlu0 %v4394_v62, %s3978_s13 }
 0x37c   : > { %1896 = vrot.lane.b32.xlu1 %v3977_v0, %s3978_s13 }
 0x37d   : > { %3719 = vrot.lane.b32.xlu0 %v3718_v59, %s3980_s19 }
 0x380   : > { %3724 = vrot.lane.b32.xlu1 %v3723_v63, %s3980_s19 }
 0x381   : > { %3729 = vrot.lane.b32.xlu0 %v3981_v9, %s3980_s19 }
 0x384   : > { %3734 = vrot.lane.b32.xlu1 %v3718_v59, %s3982_s20 }
 0x385   : > { %3739 = vrot.lane.b32.xlu0 %v3723_v63, %s3982_s20 }
 0x388   : > { %3744 = vrot.lane.b32.xlu1 %v3981_v9, %s3982_s20 }
 0x389   : > { %3749 = vrot.lane.b32.xlu0 %v3718_v59, %s3983_s21 }
 0x38c   : > { %3754 = vrot.lane.b32.xlu1 %v3723_v63, %s3983_s21 }
 0x38d   : > { %3759 = vrot.lane.b32.xlu0 %v3981_v9, %s3983_s21  ;;  %s269_s21 = sand.u32 1, %s3967_s25  }
 0x38e   : > { %s270_s15 = scalar_lea.vmem [#allocation3], %s269_s21  ;;  %s3031_s14 = scalar_lea.sflag [#allocation4], %s269_s21 }
 0x38f   : > { %s3043_s16 = sshll.u32 %s270_s15, 4  ;;  %s4769_s16 = int_to_ptr.vmem [resolvable:$true] %s3043_s16 }
 0x390   : > { %3764 = vrot.lane.b32.xlu1 %v3763_v3, %s3984_s22 }
 0x391   : > { %3769 = vrot.lane.b32.xlu0 %v3768_v4, %s3984_s22 }
 0x394   : > { %3774 = vrot.lane.b32.xlu1 %v3773_v61, %s3984_s22 }
 0x395   : > { %3779 = vrot.lane.b32.xlu0 %v3763_v3, %s3985_s23 }
 0x398   : > { %3784 = vrot.lane.b32.xlu1 %v3768_v4, %s3985_s23 }
 0x399   : > { %3789 = vrot.lane.b32.xlu0 %v3773_v61, %s3985_s23 }
 0x39c   : > { %2425 = vrot.lane.b32.xlu1 %v4394_v62, %s3986_s29 }
 0x39d   : > { %2427 = vrot.lane.b32.xlu0 %v3977_v0, %s3986_s29 }
 0x3a0   : > { %2423 = vrot.lane.b32.xlu1 %v4392_v60, %s3986_s29 }
 0x3a1   : > { %3794 = vrot.lane.b32.xlu0 %v3763_v3, %s3987_s8  ;;  %v3858_v3 = vld [vmem:[%s4810_s1 + $0xa0] sm:$0xff]  }
 0x3a4   : > { %3799 = vrot.lane.b32.xlu1 %v3768_v4, %s3987_s8 }
 0x3a5   : > { %3804 = vrot.lane.b32.xlu0 %v3773_v61, %s3987_s8  ;;  %s3356_s8 = sshll.u32 %s4050_s28, 4  ;;  %s3988_s28 = smov [#allocation3]  }
 0x3a6   : > { %s4767_s9 = scalar_lea.hbm %s4816_s7, %s3356_s8  ;;  %s3917_s13 = sshll.u32 %s3988_s28, 4  ;;  %s3918_s13 = int_to_ptr.vmem [resolvable:$false] %s3917_s13 }
 0x3a7   : > { %s3919_s19 = scalar_lea.vmem %s3918_s13, 32  ;;  %p3920_p0 = scmp.lt.s32.totalorder %s4769_s16, %s3918_s13 }
 0x3a8   : > { %2572 = vperm.xlu1 %3627, %v3320_v6  }
 0x3a9   : > { %2577 = vperm.xlu0 %3626, %v3321_v7  }
 0x3ea   : > { %v1899_v10 = vpop.permute.xlu1 %1898 }
 0x3eb   : > { %v1901_v11 = vpop.permute.xlu0 %1900 }
 0x3ec   : > { %v1903_v12 = vsel %vm389_vm0, %v1899_v10, %v1901_v11 }
 0x3ed   : > { %1909 = vmatprep.subr.bf16.mxu0 %v1903_v12 }
 0x3ee   : > { %v1897_v13 = vpop.permute.xlu1 %1896 }
 0x3ef   : > { %v1902_v14 = vsel %vm389_vm0, %v1897_v13, %v1899_v10  ;;  %v3720_v15 = vpop.permute.xlu0 %3719 }
 0x3f0   : > { %1910 = vmatpush1.bf16.msra.mxu0 %v1902_v14  ;;  %v3722_v17 = vunpack.i.h.bf16 %v3720_v15  ;;  %v3721_v18 = vunpack.i.l.bf16 %v3720_v15  ;;  %v3859_v15 = vld [vmem:[%s4810_s1 + $0xa8] sm:$0xff]  }
 0x3f2   : > { %v3725_v19 = vpop.permute.xlu1 %3724  ;;  %v1866_v25 = vsel %vm352_vm1, %v3721_v18, %v3722_v17 }
 0x3f3   : > { %v3727_v20 = vunpack.i.h.bf16 %v3725_v19  ;;  %v3726_v21 = vunpack.i.l.bf16 %v3725_v19  ;;  %3253 = vmatmul.mubr.msk.bf16.vlgmr.msra.gmra.mrb[8].mxu0 %vm389_vm0, %v3856_v16  ;;  %v3730_v22 = vpop.permute.xlu0 %3729 }
 0x3f4   : > { %v3732_v23 = vunpack.i.h.bf16 %v3730_v22  ;;  %v3731_v24 = vunpack.i.l.bf16 %v3730_v22  ;;  %1992 = vmatprep.mubr.bf16.mxu0 %v3979_v1 }
 0x3f5   : > { %v1868_v26 = vsel %vm352_vm1, %v3726_v21, %v3727_v20 }
 0x3f6   : > { %v3256_v27 = vpack.c.bf16 %v1868_v26, %v1866_v25  ;;  %v1867_v28 = vsel %vm352_vm1, %v3732_v23, %v3726_v21  ;;  %v1865_v29 = vsel %vm352_vm1, %v3731_v24, %v3721_v18  ;;  %v3735_v30 = vpop.permute.xlu1 %3734  ;;  %vm3016_vm1 = vcmask 80896  }
 0x3f7   : > { %v3259_v8 = vpack.c.bf16 %v1867_v28, %v1865_v29  ;;  %v3737_v31 = vunpack.i.h.bf16 %v3735_v30  ;;  %v3736_v32 = vunpack.i.l.bf16 %v3735_v30  ;;  %v3740_v34 = vpop.permute.xlu0 %3739 }
 0x3f8   : > { %v3742_v35 = vunpack.i.h.bf16 %v3740_v34  ;;  %v3741_v36 = vunpack.i.l.bf16 %v3740_v34  ;;  %3257 = vmatprep.subr.msk.bf16.mxu0 %vm4141_vm5, %v3256_v27 }
 0x3f9   : > { %v2016_v37 = vsel %vm508_vm4, %v3736_v32, %v3737_v31  ;;  %3260 = vmatpush1.bf16.msk.msra.mxu0 %vm4146_vm6, %v3259_v8 }
 0x3fa   : > { %v2018_v38 = vsel %vm508_vm4, %v3741_v36, %v3742_v35  ;;  %v3745_v39 = vpop.permute.xlu1 %3744 }
 0x3fb   : > { %v3266_v5 = vpack.c.bf16 %v2018_v38, %v2016_v37  ;;  %v3747_v33 = vunpack.i.h.bf16 %v3745_v39  ;;  %v3746_v40 = vunpack.i.l.bf16 %v3745_v39  ;;  %v3750_v41 = vpop.permute.xlu0 %3749  ;;  %v3861_v39 = vld [vmem:[%s4810_s1 + $0xb8] sm:$0xff]  }
 0x3fc   : > { %v3752_v46 = vunpack.i.h.bf16 %v3750_v41  ;;  %v3751_v48 = vunpack.i.l.bf16 %v3750_v41 }
 0x3fd   : > { %v2015_v44 = vsel %vm508_vm4, %v3746_v40, %v3736_v32  ;;  %v2017_v45 = vsel %vm508_vm4, %v3747_v33, %v3741_v36  ;;  %3267 = vmatprep.subr.msk.bf16.mxu0 %vm4156_vm8, %v3266_v5 }
 0x3fe   : > { %v3269_v49 = vpack.c.bf16 %v2017_v45, %v2015_v44  ;;  %v3755_v50 = vpop.permute.xlu1 %3754  ;;  %v2100_v55 = vsel %vm593_vm10, %v3751_v48, %v3752_v46 }
 0x3ff   : > { %v3757_v51 = vunpack.i.h.bf16 %v3755_v50  ;;  %v3756_v53 = vunpack.i.l.bf16 %v3755_v50  ;;  %3261 = vmatmul.mubr.msk.bf16.vlgmr.msra.gmra.mrb[8].mxu0 %vm389_vm0, %v3857_v42  ;;  %v3760_v54 = vpop.permute.xlu0 %3759 }
 0x400   : > { %3270 = vmatpush1.bf16.msk.msra.mxu0 %vm4167_vm11, %v3269_v49  ;;  %2072 = vmatprep.mubr.bf16.mxu0 %v3979_v1  ;;  %v3762_v58 = vunpack.i.h.bf16 %v3760_v54  ;;  %v3761_v59 = vunpack.i.l.bf16 %v3760_v54 }
 0x401   : > { %v2102_v56 = vsel %vm593_vm10, %v3756_v53, %v3757_v51 }
 0x402   : > { %v3276_v57 = vpack.c.bf16 %v2102_v56, %v2100_v55  ;;  %v2101_v61 = vsel %vm593_vm10, %v3762_v58, %v3756_v53  ;;  %v2099_v63 = vsel %vm593_vm10, %v3761_v59, %v3751_v48  ;;  %v3765_v6 = vpop.permute.xlu1 %3764  ;;  %v3862_v48 = vld [vmem:[%s4810_s1 + $0xc0] sm:$0xff]   ;;  %v3863_v58 = vld [vmem:[%s4810_s1 + $0xc8] sm:$0xff]  }
 0x403   : > { %v3279_v4 = vpack.c.bf16 %v2101_v61, %v2099_v63  ;;  %v3770_v7 = vpop.permute.xlu0 %3769  ;;  %v3767_v10 = vunpack.i.h.bf16 %v3765_v6  ;;  %v3766_v11 = vunpack.i.l.bf16 %v3765_v6 }
 0x404   : > { %3277 = vmatprep.subr.msk.bf16.mxu0 %vm4141_vm5, %v3276_v57  ;;  %v3772_v12 = vunpack.i.h.bf16 %v3770_v7  ;;  %v3771_v13 = vunpack.i.l.bf16 %v3770_v7 }
 0x405   : > { %v2254_v16 = vsel %vm748_vm12, %v3766_v11, %v3767_v10 }
 0x406   : > { %v3775_v14 = vpop.permute.xlu1 %3774  ;;  %v2256_v17 = vsel %vm748_vm12, %v3771_v13, %v3772_v12 }
 0x407   : > { %v3290_v18 = vpack.c.bf16 %v2256_v17, %v2254_v16  ;;  %v3777_v19 = vunpack.i.h.bf16 %v3775_v14  ;;  %v3776_v20 = vunpack.i.l.bf16 %v3775_v14  ;;  %v3780_v21 = vpop.permute.xlu0 %3779  ;;  %v3865_v16 = vld [vmem:[%s4812_s3] ss:$8 sps:$4 sm:$0xff]   ;;  %v3867_v17 = vld [vmem:[%s4812_s3 + $0x4] ss:$8 sps:$4 sm:$0xff]  }
 0x408   : > { %v3782_v24 = vunpack.i.h.bf16 %v3780_v21  ;;  %v3781_v25 = vunpack.i.l.bf16 %v3780_v21  ;;  %2863 = vmatprep.subr.bf16.mxu1 %v3867_v17 }
 0x409   : > { %v2253_v26 = vsel %vm748_vm12, %v3776_v20, %v3766_v11  ;;  %v2255_v27 = vsel %vm748_vm12, %v3777_v19, %v3771_v13  ;;  %2864 = vmatpush1.bf16.msra.mxu1 %v3865_v16  ;;  %v3868_v20 = vld [vmem:[%s4812_s3 + $0x10] ss:$8 sps:$4 sm:$0xff]  }
 0x40a   : > { %v3293_v29 = vpack.c.bf16 %v2255_v27, %v2253_v26  ;;  %v2338_v30 = vsel %vm833_vm13, %v3781_v25, %v3782_v24  ;;  %v3876_v24 = vld [vmem:[%s4812_s3 + $0x34] ss:$8 sps:$4 sm:$0xff]   ;;  %v3879_v26 = vld [vmem:[%s4812_s3 + $0x44] ss:$8 sps:$4 sm:$0xff]   ;;  %v3877_v27 = vld [vmem:[%s4812_s3 + $0x40] ss:$8 sps:$4 sm:$0xff]  }
 0x40b   : > { %3271 = vmatmul.mubr.msk.bf16.vlgmr.msra.gmra.mrb[8].mxu0 %vm389_vm0, %v3858_v3  ;;  %v3790_v31 = vpop.permute.xlu0 %3789 }
 0x40c   : > { %3280 = vmatpush1.bf16.msk.msra.mxu0 %vm4146_vm6, %v3279_v4  ;;  %2156 = vmatprep.mubr.bf16.mxu0 %v3979_v1  ;;  %v3792_v34 = vunpack.i.h.bf16 %v3790_v31  ;;  %v3791_v35 = vunpack.i.l.bf16 %v3790_v31  ;;  %v3886_v31 = vld [vmem:[%s4812_s3 + $0x70] ss:$8 sps:$4 sm:$0xff]  }
 0x40d   : > { %2182 = vmatprep.subr.bf16.mxu0 %v4394_v62  ;;  %v3785_v62 = vpop.permute.xlu1 %3784 }
 0x40e   : > { %v3787_v22 = vunpack.i.h.bf16 %v3785_v62  ;;  %v3786_v23 = vunpack.i.l.bf16 %v3785_v62  ;;  %v2337_v37 = vsel %vm833_vm13, %v3791_v35, %v3781_v25  ;;  %v3874_v25 = vld [vmem:[%s4812_s3 + $0x30] ss:$8 sps:$4 sm:$0xff]   ;;  %v3894_v35 = vld [vmem:[%s4812_s3 + $0x94] ss:$8 sps:$4 sm:$0xff]  }
 0x40f   : > { %v2428_v5 = vpop.permute.xlu0 %2427 }
 0x410   : > { %v2340_v28 = vsel %vm833_vm13, %v3786_v23, %v3787_v22  ;;  %v2339_v36 = vsel %vm833_vm13, %v3792_v34, %v3786_v23  ;;  %v3873_v22 = vld [vmem:[%s4812_s3 + $0x24] ss:$8 sps:$4 sm:$0xff]   ;;  %v3871_v23 = vld [vmem:[%s4812_s3 + $0x20] ss:$8 sps:$4 sm:$0xff]  }
 0x411   : > { %v3300_v8 = vpack.c.bf16 %v2340_v28, %v2338_v30  ;;  %v2426_v32 = vpop.permute.xlu1 %2425  ;;  %v3303_v33 = vpack.c.bf16 %v2339_v36, %v2337_v37  ;;  %v3880_v28 = vld [vmem:[%s4812_s3 + $0x50] ss:$8 sps:$4 sm:$0xff]   ;;  %v3883_v30 = vld [vmem:[%s4812_s3 + $0x60] ss:$8 sps:$4 sm:$0xff]   ;;  %v3897_v37 = vld [vmem:[%s4812_s3 + $0xa4] ss:$8 sps:$4 sm:$0xff]  }
 0x412   : > { %v2430_v43 = vsel %vm926_vm14, %v2426_v32, %v2428_v5  ;;  %v3889_v34 = vld [vmem:[%s4812_s3 + $0x80] ss:$8 sps:$4 sm:$0xff]   ;;  %v3892_v36 = vld [vmem:[%s4812_s3 + $0x90] ss:$8 sps:$4 sm:$0xff]  }
 0x413   : > { %v3795_v41 = vpop.permute.xlu0 %3794  ;;  %v3898_v5 = vld [vmem:[%s4812_s3 + $0xb0] ss:$8 sps:$4 sm:$0xff]  }
 0x414   : > { %v3797_v45 = vunpack.i.h.bf16 %v3795_v41  ;;  %v3796_v46 = vunpack.i.l.bf16 %v3795_v41  ;;  %v3904_v41 = vld [vmem:[%s4812_s3 + $0xd0] ss:$8 sps:$4 sm:$0xff]  }
 0x415   : > { %v2424_v38 = vpop.permute.xlu1 %2423 }
 0x416   : > { %v2496_v47 = vsel %vm993_vm15, %v3796_v46, %v3797_v45  ;;  %v2429_v50 = vsel %vm926_vm14, %v2424_v38, %v2426_v32  ;;  %v3891_v32 = vld [vmem:[%s4812_s3 + $0x84] ss:$8 sps:$4 sm:$0xff]   ;;  %v3895_v38 = vld [vmem:[%s4812_s3 + $0xa0] ss:$8 sps:$4 sm:$0xff]  }
 0x417   : > { %3281 = vmatmul.mubr.msk.bf16.vlgmr.msra.gmra.mrb[8].mxu0 %vm389_vm0, %v3859_v15  ;;  %v3805_v53 = vpop.permute.xlu0 %3804 }
 0x418   : > { %2183 = vmatpush1.bf16.msra.mxu0 %v4392_v60  ;;  %2214 = vmatprep.mubr.bf16.mxu0 %v3979_v1  ;;  %v3860_v60 = vld [vmem:[%s4810_s1 + $0xb0] sm:$0xff]   ;;  %v3807_v54 = vunpack.i.h.bf16 %v3805_v53  ;;  %v3806_v55 = vunpack.i.l.bf16 %v3805_v53 }
 0x419   : > { %3291 = vmatprep.subr.msk.bf16.mxu0 %vm4156_vm8, %v3290_v18  ;;  %v3800_v40 = vpop.permute.xlu1 %3799  ;;  %v3870_v18 = vld [vmem:[%s4812_s3 + $0x14] ss:$8 sps:$4 sm:$0xff]  }
 0x41a   : > { %v3802_v42 = vunpack.i.h.bf16 %v3800_v40  ;;  %v3801_v44 = vunpack.i.l.bf16 %v3800_v40  ;;  %v2495_v57 = vsel %vm993_vm15, %v3806_v55, %v3796_v46  ;;  %2865 = vmatprep.subr.bf16.mxu1 %v3870_v18  ;;  %v3906_v40 = vld [vmem:[%s4812_s3 + $0xd4] ss:$8 sps:$4 sm:$0xff]  }
 0x41b   : > { %2866 = vmatpush1.bf16.msra.mxu1 %v3868_v20  ;;  %v2914_v20 = vld [vmem:[%s4814_s5] sm:$0xff] }
 0x41c   : > { %v2498_v49 = vsel %vm993_vm15, %v3801_v44, %v3802_v42  ;;  %v2497_v56 = vsel %vm993_vm15, %v3807_v54, %v3801_v44  ;;  %2867 = vmatprep.subr.bf16.mxu1 %v3873_v22  ;;  %v3907_v42 = vld [vmem:[%s4812_s3 + $0xe0] ss:$8 sps:$4 sm:$0xff]   ;;  %v3909_v44 = vld [vmem:[%s4812_s3 + $0xe4] ss:$8 sps:$4 sm:$0xff]  }
 0x41d   : > { %v3314_v51 = vpack.c.bf16 %v2498_v49, %v2496_v47  ;;  %v3317_v59 = vpack.c.bf16 %v2497_v56, %v2495_v57  ;;  %v3910_v47 = vld [vmem:[%s4812_s3 + $0xf0] ss:$8 sps:$4 sm:$0xff]  }
 0x41f   : > { %2868 = vmatpush1.bf16.msra.mxu1 %v3871_v23 }
 0x420   : > { %2869 = vmatprep.subr.bf16.mxu1 %v3876_v24 }
 0x423   : > { %3285 = vmatmul.mubr.msk.bf16.vlgmr.msra.gmra.mrb[8].mxu0 %vm389_vm0, %v3860_v60  ;;  %2870 = vmatpush1.bf16.msra.mxu1 %v3874_v25  ;;  %v3882_v60 = vld [vmem:[%s4812_s3 + $0x54] ss:$8 sps:$4 sm:$0xff]  }
 0x424   : > { %3294 = vmatpush1.bf16.msk.msra.mxu0 %vm4167_vm11, %v3293_v29  ;;  %2310 = vmatprep.mubr.bf16.mxu0 %v3979_v1  ;;  %v3885_v29 = vld [vmem:[%s4812_s3 + $0x64] ss:$8 sps:$4 sm:$0xff]  }
 0x425   : > { %3301 = vmatprep.subr.msk.bf16.mxu0 %vm4141_vm5, %v3300_v8  ;;  %2871 = vmatprep.subr.bf16.mxu1 %v3879_v26  ;;  %v3888_v8 = vld [vmem:[%s4812_s3 + $0x74] ss:$8 sps:$4 sm:$0xff]  }
 0x427   : > { %v2573_v63 = vpop.permute.xlu1 %2572  ;;  %2872 = vmatpush1.bf16.msra.mxu1 %v3877_v27 }
 0x428   : > { %v2578_v4 = vpop.permute.xlu0 %2577  ;;  %2873 = vmatprep.subr.bf16.mxu1 %v3882_v60 }
 0x42b   : > { %2874 = vmatpush1.bf16.msra.mxu1 %v3880_v28  ;;  %v2916_v28 = vld [vmem:[%s4814_s5 + $0x10] sm:$0xff] }
 0x42c   : > { %2875 = vmatprep.subr.bf16.mxu1 %v3885_v29  ;;  %v2917_v29 = vld [vmem:[%s4814_s5 + $0x18] sm:$0xff] }
 0x42f   : > { %3295 = vmatmul.mubr.msk.bf16.vlgmr.msra.gmra.mrb[8].mxu0 %vm389_vm0, %v3861_v39  ;;  %2876 = vmatpush1.bf16.msra.mxu1 %v3883_v30  ;;  %v3900_v39 = vld [vmem:[%s4812_s3 + $0xb4] ss:$8 sps:$4 sm:$0xff]   ;;  %v3364_v30 = vpack.c.bf16 %v2917_v29, %v2916_v28 }
 0x430   : > { %3304 = vmatpush1.bf16.msk.msra.mxu0 %vm4146_vm6, %v3303_v33  ;;  %2394 = vmatprep.mubr.bf16.mxu0 %v3979_v1  ;;  %v3903_v33 = vld [vmem:[%s4812_s3 + $0xc4] ss:$8 sps:$4 sm:$0xff]  }
 0x431   : > { %2436 = vmatprep.subr.bf16.mxu0 %v2430_v43  ;;  %2877 = vmatprep.subr.bf16.mxu1 %v3888_v8  ;;  %v3901_v43 = vld [vmem:[%s4812_s3 + $0xc0] ss:$8 sps:$4 sm:$0xff]  }
 0x432   : > { %v2918_v8 = vld [vmem:[%s4814_s5 + $0x20] sm:$0xff] }
 0x433   : > { %2878 = vmatpush1.bf16.msra.mxu1 %v3886_v31  ;;  %v2919_v31 = vld [vmem:[%s4814_s5 + $0x28] sm:$0xff] }
 0x434   : > { %2879 = vmatprep.subr.bf16.mxu1 %v3891_v32  ;;  %v3367_v32 = vpack.c.bf16 %v2919_v31, %v2918_v8 }
 0x437   : > { %2880 = vmatpush1.bf16.msra.mxu1 %v3889_v34  ;;  %v2920_v34 = vld [vmem:[%s4814_s5 + $0x30] sm:$0xff] }
 0x438   : > { %2881 = vmatprep.subr.bf16.mxu1 %v3894_v35  ;;  %v2921_v35 = vld [vmem:[%s4814_s5 + $0x38] sm:$0xff] }
 0x43b   : > { %3305 = vmatmul.mubr.msk.bf16.vlgmr.msra.gmra.mrb[8].mxu0 %vm389_vm0, %v3862_v48  ;;  %2882 = vmatpush1.bf16.msra.mxu1 %v3892_v36  ;;  %v3370_v36 = vpack.c.bf16 %v2921_v35, %v2920_v34 }
 0x43c   : > { %2437 = vmatpush1.bf16.msra.mxu0 %v2429_v50  ;;  %2468 = vmatprep.mubr.bf16.mxu0 %v3979_v1  ;;  %v3912_v50 = vld [vmem:[%s4812_s3 + $0xf4] ss:$8 sps:$4 sm:$0xff]  }
 0x43d   : > { %3315 = vmatprep.subr.msk.bf16.mxu0 %vm4156_vm8, %v3314_v51  ;;  %2883 = vmatprep.subr.bf16.mxu1 %v3897_v37  ;;  %v2922_v37 = vld [vmem:[%s4814_s5 + $0x40] sm:$0xff] }
 0x43f   : > { %2884 = vmatpush1.bf16.msra.mxu1 %v3895_v38  ;;  %v2923_v38 = vld [vmem:[%s4814_s5 + $0x48] sm:$0xff] }
 0x440   : > { %2885 = vmatprep.subr.bf16.mxu1 %v3900_v39  ;;  %v3373_v39 = vpack.c.bf16 %v2923_v38, %v2922_v37 }
 0x443   : > { %2886 = vmatpush1.bf16.msra.mxu1 %v3898_v5  ;;  %v2924_v5 = vld [vmem:[%s4814_s5 + $0x50] sm:$0xff] }
 0x444   : > { %2887 = vmatprep.subr.bf16.mxu1 %v3903_v33  ;;  %v2925_v33 = vld [vmem:[%s4814_s5 + $0x58] sm:$0xff] }
 0x447   : > { %3309 = vmatmul.mubr.msk.bf16.vlgmr.msra.gmra.mrb[8].mxu0 %vm389_vm0, %v3863_v58  ;;  %2888 = vmatpush1.bf16.msra.mxu1 %v3901_v43  ;;  %v3376_v43 = vpack.c.bf16 %v2925_v33, %v2924_v5 }
 0x448   : > { %3318 = vmatpush1.bf16.msk.msra.mxu0 %vm4167_vm11, %v3317_v59  ;;  %2552 = vmatprep.mubr.bf16.mxu0 %v3979_v1 }
 0x449   : > { %2889 = vmatprep.subr.bf16.mxu1 %v3906_v40  ;;  %v2926_v40 = vld [vmem:[%s4814_s5 + $0x60] sm:$0xff] }
 0x44b   : > { %2890 = vmatpush1.bf16.msra.mxu1 %v3904_v41  ;;  %v2927_v41 = vld [vmem:[%s4814_s5 + $0x68] sm:$0xff] }
 0x44c   : > { %2891 = vmatprep.subr.bf16.mxu1 %v3909_v44  ;;  %v2928_v44 = vld [vmem:[%s4814_s5 + $0x70] sm:$0xff] }
 0x44f   : > { %2892 = vmatpush1.bf16.msra.mxu1 %v3907_v42  ;;  %v3379_v42 = vpack.c.bf16 %v2927_v41, %v2926_v40 }
 0x450   : > { %2893 = vmatprep.subr.bf16.mxu1 %v3912_v50  ;;  %v2932_v50 = vld [vmem:[%s4814_s5 + $0x90] sm:$0xff] }
 0x453   : > { %3319 = vmatmul.mubr.msk.bf16.vlgmr.msra.gmra.mrb[8].mxu0 %vm389_vm0, %v3864_v52  ;;  %2894 = vmatpush1.bf16.msra.mxu1 %v3910_v47  ;;  %vm2934_vm0 = vcmask 261120  }
 0x454   : > { %3360 = vmatprep.subr.bf16.mxu1 %v3977_v0 }
 0x526   : > { %v2554_v61 = vpop.f32.mrb[8].mxu0 }
 0x527   : > { %v2556_v3 = vpop.f32.mrb[9].mxu0  ;;  %v4539_v2 = vadd.f32 %v2573_v63, %v2554_v61 }
 0x528   : > { %v4535_v6 = vadd.f32 %v2573_v63, %v2556_v3  ;;  %v2558_v7 = vpop.f32.mrb[10].mxu0 }
 0x529   : > { %v4537_v10 = vadd.f32 %v2578_v4, %v2558_v7  ;;  %v2560_v11 = vpop.f32.mrb[11].mxu0  ;;  %v2584_v62 = vmax.f32 %v4539_v2, 0.0 }
 0x52a   : > { %v2585_v1 = vmax.f32 %v4535_v6, 0.0  ;;  %v4542_v12 = vadd.f32 %v2578_v4, %v2560_v11 }
 0x52b   : > { %v2586_v14 = vmax.f32 %v4537_v10, 0.0 }
 0x52c   : > { %v3808_v13 = vpack.i.bf16 %v3981_v9, %v2585_v1  ;;  %v2587_v15 = vmax.f32 %v4542_v12, 0.0 }
 0x52d   : > { %v3818_v21 = vpack.i.bf16 %v2586_v14, %v2584_v62 }
 0x52e   : > { %v3813_v19 = vpack.i.bf16 %v3981_v9, %v2587_v15  ;;  %3809 = vrot.lane.b32.xlu1 %v3808_v13, %s3984_s22 }
 0x530   : > { %3814 = vrot.lane.b32.xlu0 %v3813_v19, %s3984_s22 }
 0x532   : > { %3819 = vrot.lane.b32.xlu1 %v3818_v21, %s3984_s22  ;;  %v2915_v21 = vld [vmem:[%s4814_s5 + $0x8] sm:$0xff] }
 0x533   : > { %v3361_v27 = vpack.c.bf16 %v2915_v21, %v2914_v20 }
 0x5a0   : > { %v3810_v45 = vpop.permute.xlu1 %3809 }
 0x5a1   : > { %v3812_v46 = vunpack.i.h.bf16 %v3810_v45  ;;  %v3811_v48 = vunpack.i.l.bf16 %v3810_v45  ;;  %v2929_v45 = vld [vmem:[%s4814_s5 + $0x78] sm:$0xff] }
 0x5a2   : > { %v3815_v49 = vpop.permute.xlu0 %3814 }
 0x5a3   : > { %v2617_v51 = vsel %vm748_vm12, %v3811_v48, %v3812_v46  ;;  %v3817_v53 = vunpack.i.h.bf16 %v3815_v49  ;;  %v3816_v54 = vunpack.i.l.bf16 %v3815_v49  ;;  %v3382_v46 = vpack.c.bf16 %v2929_v45, %v2928_v44  ;;  %v2931_v49 = vld [vmem:[%s4814_s5 + $0x88] sm:$0xff] }
 0x5a4   : > { %v3820_v55 = vpop.permute.xlu1 %3819  ;;  %v2625_v56 = vmax.f32 %v2585_v1, %v2617_v51  ;;  %v2933_v51 = vld [vmem:[%s4814_s5 + $0x98] sm:$0xff] }
 0x5a5   : > { %v2619_v57 = vsel %vm748_vm12, %v3816_v54, %v3817_v53  ;;  %v3822_v58 = vunpack.i.h.bf16 %v3820_v55  ;;  %v3821_v59 = vunpack.i.l.bf16 %v3820_v55  ;;  %v3388_v53 = vpack.c.bf16 %v2933_v51, %v2932_v50 }
 0x5a6   : > { %v3823_v52 = vpack.i.bf16 %v3981_v9, %v2625_v56  ;;  %v2627_v61 = vmax.f32 %v2587_v15, %v2619_v57  ;;  %v2909_v57 = vld [vmem:[%s4813_s4 + $0x18] sm:$0xff] }
 0x5a7   : > { %v2616_v63 = vsel %vm748_vm12, %v3821_v59, %v3811_v48  ;;  %v2618_v3 = vsel %vm748_vm12, %v3822_v58, %v3816_v54  ;;  %v2930_v48 = vld [vmem:[%s4814_s5 + $0x80] sm:$0xff]  ;;  %v2907_v54 = vld [vmem:[%s4813_s4 + $0x8] sm:$0xff] }
 0x5a8   : > { %3824 = vrot.lane.b32.xlu0 %v3823_v52, %s3986_s29  ;;  %v3828_v4 = vpack.i.bf16 %v3981_v9, %v2627_v61  ;;  %v2624_v6 = vmax.f32 %v2584_v62, %v2616_v63  ;;  %v2626_v7 = vmax.f32 %v2586_v14, %v2618_v3  ;;  %v3385_v47 = vpack.c.bf16 %v2931_v49, %v2930_v48  ;;  %v2908_v63 = vld [vmem:[%s4813_s4 + $0x10] sm:$0xff] }
 0x5aa   : > { %3829 = vrot.lane.b32.xlu1 %v3828_v4, %s3986_s29  ;;  %v3833_v11 = vpack.i.bf16 %v2626_v7, %v2624_v6 }
 0x5ac   : > { %3834 = vrot.lane.b32.xlu0 %v3833_v11, %s3986_s29  ;;  %s3913_s29 = scalar_lea.vmem %s4769_s16, 16 }
 0x5ad   : > { %p3914_p11 = scmp.ne.s32.totalorder %s4769_s16, %s3913_s29  ;;  %p3921_p1 = scmp.lt.s32.totalorder %s3919_s19, %s3913_s29 }
 0x5af   : > { %p3915_p12 = pnand %p3914_p11, %p4067_p5  ;;  %p3922_p2 = por %p3921_p1, %p3920_p0 }
 0x5b1   : > { %p3916_p13 = pneg %p3915_p12 }
 0x5b3   : > { %p3923_p3 = pnand %p3922_p2, %p3916_p13 }
 0x61a   : > { %v3825_v1 = vpop.permute.xlu0 %3824 }
 0x61b   : > { %v3827_v12 = vunpack.i.h.bf16 %v3825_v1  ;;  %v3826_v13 = vunpack.i.l.bf16 %v3825_v1 }
 0x61c   : > { %v3830_v15 = vpop.permute.xlu1 %3829 }
 0x61d   : > { %v2658_v16 = vsel %vm926_vm14, %v3826_v13, %v3827_v12  ;;  %v3832_v17 = vunpack.i.h.bf16 %v3830_v15  ;;  %v3831_v18 = vunpack.i.l.bf16 %v3830_v15 }
 0x61e   : > { %v3835_v9 = vpop.permute.xlu0 %3834  ;;  %v2666_v10 = vmax.f32 %v2625_v56, %v2658_v16  ;;  %v2906_v56 = vld [vmem:[%s4813_s4] sm:$0xff] }
 0x61f   : > { %v2660_v2 = vsel %vm926_vm14, %v3831_v18, %v3832_v17  ;;  %v3837_v62 = vunpack.i.h.bf16 %v3835_v9  ;;  %v3836_v19 = vunpack.i.l.bf16 %v3835_v9 }
 0x620   : > { %v2668_v14 = vmax.f32 %v2627_v61, %v2660_v2 }
 0x621   : > { %v2659_v22 = vsel %vm926_vm14, %v3837_v62, %v3831_v18  ;;  %v2657_v23 = vsel %vm926_vm14, %v3836_v19, %v3826_v13  ;;  %v3026_v62 = vld [vmem:[%s4815_s6] sm:$0x1] }
 0x622   : > { %v2667_v24 = vmax.f32 %v2626_v7, %v2659_v22  ;;  %v2665_v25 = vmax.f32 %v2624_v6, %v2657_v23  ;;  %v2670_v26 = vpack.c.bf16 %v2668_v14, %v2666_v10 }
 0x624   : > { %2895 = vmatprep.mubr.bf16.mxu1 %v2670_v26  ;;  %v2669_v60 = vpack.c.bf16 %v2667_v24, %v2665_v25 }
 0x626   : > { %2896 = vmatmul.mubr.bf16.vlgmr.msra.gmra.mrb[4].mxu1 %v2669_v60 }
 0x627   : > { %3362 = vmatpush1.bf16.msra.mxu1 %v3361_v27 }
 0x628   : > { %3363 = vmatprep.subr.bf16.mxu1 %v3977_v0 }
 0x62b   : > { %3365 = vmatpush1.bf16.msra.mxu1 %v3364_v30 }
 0x62c   : > { %3366 = vmatprep.subr.bf16.mxu1 %v3977_v0 }
 0x62f   : > { %3368 = vmatpush1.bf16.msra.mxu1 %v3367_v32 }
 0x630   : > { %3369 = vmatprep.subr.bf16.mxu1 %v3977_v0 }
 0x633   : > { %3371 = vmatpush1.bf16.msra.mxu1 %v3370_v36 }
 0x634   : > { %3372 = vmatprep.subr.bf16.mxu1 %v3977_v0 }
 0x637   : > { %3374 = vmatpush1.bf16.msra.mxu1 %v3373_v39 }
 0x638   : > { %3375 = vmatprep.subr.bf16.mxu1 %v3977_v0 }
 0x63b   : > { %3377 = vmatpush1.bf16.msra.mxu1 %v3376_v43 }
 0x63c   : > { %3378 = vmatprep.subr.bf16.mxu1 %v3977_v0 }
 0x63f   : > { %3380 = vmatpush1.bf16.msra.mxu1 %v3379_v42 }
 0x640   : > { %3381 = vmatprep.subr.bf16.mxu1 %v3977_v0 }
 0x643   : > { %3383 = vmatpush1.bf16.msra.mxu1 %v3382_v46 }
 0x644   : > { %3384 = vmatprep.subr.bf16.mxu1 %v3977_v0 }
 0x647   : > { %3386 = vmatpush1.bf16.msra.mxu1 %v3385_v47 }
 0x648   : > { %3387 = vmatprep.subr.bf16.mxu1 %v3977_v0 }
 0x64b   : > { %3389 = vmatpush1.bf16.msra.mxu1 %v3388_v53 }
 0x6f9   : > { %v2897_v55 = vpop.f32.mrb[4].mxu1 }
 0x6fa   : > { %v2899_v0 = vpop.f32.mrb[5].mxu1  ;;  %v2910_v52 = vmul.f32 %v2906_v56, %v2897_v55 }
 0x6fb   : > { %v2911_v58 = vmul.f32 %v2907_v54, %v2899_v0  ;;  %v2901_v59 = vpop.f32.mrb[6].mxu1 }
 0x6fc   : > { %v2903_v61 = vpop.f32.mrb[7].mxu1  ;;  %v2912_v4 = vmul.f32 %v2908_v63, %v2901_v59 }
 0x6fd   : > { %v2913_v3 = vmul.f32 %v2909_v57, %v2903_v61  ;;  %3354 = vmatprep.mubr.msk.f32.mxu1 %vm2934_vm0, %v2911_v58 }
 0x6fe   : > { %3006 = vmatmul.mubr.f32.vlgmr.msra.gmra.mrb[8].mxu1 %v2910_v52 }
 0x6ff   : > { %3355 = vmatprep.mubr.msk.f32.mxu1 %vm2934_vm0, %v2913_v3 }
 0x702   : > { %3011 = vmatmul.mubr.f32.gmra.mrb[10].mxu1 %v2912_v4 }
 0x7d1   : > { %v3007_v6 = vpop.f32.mrb[8].mxu1 }
 0x7d2   : > { %v3009_v7 = vpop.f32.mrb[9].mxu1  ;;  %v3017_v1 = vsel %vm3016_vm1, %v3007_v6, 0.0 }
 0x7d5   : > { %v3012_v11 = vpop.f32.mrb[10].mxu1 }
 0x7d6   : > { %v3018_v12 = vsel %vm3016_vm1, %v3012_v11, 0.0  ;;  %v3014_v13 = vpop.f32.mrb[11].mxu1 }
 0x7d7   : > { %v3019_v15 = vadd.f32 %v3018_v12, %v3017_v1 }
 0x7d9   : > { %v3020_v16 = vrot.slane %v3019_v15, 4 }
 0x7db   : > { %v3021_v17 = vadd.f32 %v3020_v16, %v3019_v15 }
 0x7dd   : > { %v3022_v18 = vrot.slane %v3021_v17, 2 }
 0x7df   : > { %v3023_v9 = vadd.f32 %v3022_v18, %v3021_v17 }
 0x7e1   : > { %v3024_v2 = vrot.slane %v3023_v9, 1 }
 0x7e3   : > { %v3025_v19 = vadd.f32 %v3024_v2, %v3023_v9 }
 0x7e5   : > { %v3027_v10 = vadd.f32 %v3026_v62, %v3025_v19 }
 0x7e7   : > { %3029 = vst.msk [vmem:[%s270_s15] sm:$0x1] %vm3028_vm2, %v3027_v10 }
 0x7e8   : > { %3926 = shalt.err (!%p3923_p3)
}
 0x7e9   : > { %s3927_s20 = scalar_lea.hbm %s4767_s9, 16  ;;  %s3931_s23 = scalar_lea.hbm %s4816_s7, 32 }
 0x7ea   : > { %p3928_p4 = scmp.ne.s32.totalorder %s4767_s9, %s3927_s20  ;;  %p3932_p9 = scmp.lt.u32.totalorder %s4767_s9, %s4816_s7 }
 0x7eb   : > { %p3933_p10 = scmp.lt.u32.totalorder %s3931_s23, %s3927_s20  ;;  %p3935_p12 = scmp.lt.u32.totalorder %s3927_s20, %s4767_s9 }
 0x7ec   : > { %p3929_p7 = pnand %p3928_p4, %p4067_p5 }
 0x7ed   : > { %p3934_p11 = por %p3933_p10, %p3932_p9 }
 0x7ee   : > { %p3930_p8 = pneg %p3929_p7 }
 0x7ef   : > { %p3936_p13 = por %p3935_p12, %p3934_p11 }
 0x7f1   : > { %p3937_p0 = pnand %p3936_p13, %p3930_p8 }
 0x7f3   : > { %3940 = shalt.err (!%p3937_p0)
}
 0x7f4   : > { %3486 = dma.vmem_to_hbm [thread:$0]  (%p4067_p5), %s4769_s16, 16, %s4767_s9, %s3031_s14  }
 0x7f5 PF: > { %p3492_p1 = scmp.ge.s32.totalorder %s3975_s27, 2  ;;  %s3055_s17 = sand.u32 1, %s3963_s24  }
 0x7f6   : > { %s3056_s18 = scalar_lea.sflag [#allocation4], %s3055_s17 }
 0x7f7   : > { %p3489_p2 = pnand %p3492_p1, %p4071_p6 }
 0x7f9   : > { %3958 = dma.done.wait (!%p3489_p2), %s3056_s18, 16  }
 0x7fa   : > { %3960 = vsyncadd (!%p3489_p2), %s3056_s18, 4294967280  ;;  %p17_p3 = scmp.ge.s32.totalorder %s4054_s30, 4   ;;  %s4827_s24 = smov %s3967_s25 }
 0x7fb   : > { %s4828_s25 = smov %s3971_s26  ;;  %s4829_s26 = smov %s4065_s10 }
 0x7fc   : > { %s4830_s27 = smov %s4054_s30  ;;  %19 = sbr.rel (!%p17_p3) target bundleno = 3 (0x3), region = 111 }
 0x803   :  { %3060 = vsyncpa [#allocation4], 1 }
 0x804   :  { %3062 = vsyncpa [#allocation4 + $0x1], 1 }

</bundles_post_ra>
